<compile_context>
chip_gen: v7x
topology: tpu7x:2x2x1
jax: 0.10.0
libtpu: 0.0.40
codegen_flags: <defaults>
</compile_context>

<pallas_src>
import functools

import jax
import jax.numpy as jnp
from jax.experimental import pallas as pl
from jax.experimental.pallas import tpu as pltpu


# ---------------------------------------------------------------------------
# Optional single-buffering for grid-constant operands (perf feedback: don't
# double-buffer conv weights whose block index never changes).  Probed once so
# the script still runs cleanly on Pallas versions without BlockSpec.pipeline_mode.
# ---------------------------------------------------------------------------
_BUFFERED_ONE_OK = None


def _probe_buffered_one() -> bool:
    global _BUFFERED_ONE_OK
    if _BUFFERED_ONE_OK is not None:
        return _BUFFERED_ONE_OK

    def _k(x_ref, o_ref):
        o_ref[...] = x_ref[...] + 1.0

    try:
        spec = pl.BlockSpec((8, 128), lambda i: (0, 0),
                            pipeline_mode=pl.Buffered(1))
        f = pl.pallas_call(
            _k,
            out_shape=jax.ShapeDtypeStruct((8, 128), jnp.float32),
            grid=(2,),
            in_specs=[spec],
            out_specs=pl.BlockSpec((8, 128), lambda i: (0, 0)),
        )
        y = jax.block_until_ready(f(jnp.ones((8, 128), jnp.float32)))
        _BUFFERED_ONE_OK = bool(jnp.allclose(y, 2.0))
    except Exception:
        _BUFFERED_ONE_OK = False
    return _BUFFERED_ONE_OK


def _const_spec(shape):
    """BlockSpec for an operand whose block index is constant across a 1-D grid."""
    idx = lambda b: (0,) * len(shape)
    if _probe_buffered_one():
        return pl.BlockSpec(shape, idx, pipeline_mode=pl.Buffered(1))
    return pl.BlockSpec(shape, idx)


# ---------------------------------------------------------------------------
# Kernel 1: fused conv stack (conv1..conv4 + the two maxpools), one batch row
# per grid step.  All intermediates stay in VMEM scratch.
# ---------------------------------------------------------------------------
def _conv_stack_kernel(x_ref, w1_ref, w2_ref, w3_ref, w4_ref,
                       b1_ref, b2_ref, b3_ref, b4_ref,
                       o_ref, pool_ref, s1_ref, s2_ref, s3_ref):
    """x_ref: (1, T1, K1*E) im2col'd conv1 input (bf16)
       w1_ref: (K1*E, F) flattened conv1 weight; w2..w4: (3, F, F); b*: (1, F) f32
       o_ref: (1, T4, F) conv4 output (flattened to (B, T4*F) by the caller)
       pool_ref: (T1, F) f32 maxpool staging; s1/s2/s3: bf16 stage activations."""
    cdt = o_ref.dtype

    def pool3(y_f32, n_out):
        # MaxPool((3,1)/(3,1)), floor mode: max taken in f32 *before* the bf16
        # cast, via stride-3 reads of an f32 staging buffer.
        pool_ref[pl.ds(0, y_f32.shape[0]), :] = y_f32
        p0 = pool_ref[pl.ds(0, n_out, stride=3), :]
        p1 = pool_ref[pl.ds(1, n_out, stride=3), :]
        p2 = pool_ref[pl.ds(2, n_out, stride=3), :]
        return jnp.maximum(jnp.maximum(p0, p1), p2)

    def conv_relu(src_ref, w_ref, b_ref, t_out):
        # 1-D conv along seq with full channel mixing; taps are contiguous
        # row-offset reads from VMEM scratch (no batch-gather copies);
        # f32 accumulation, bias + ReLU in f32.
        k_taps = w_ref.shape[0]
        acc = jnp.dot(src_ref[pl.ds(0, t_out), :], w_ref[0],
                      preferred_element_type=jnp.float32)
        for k in range(1, k_taps):
            acc = acc + jnp.dot(src_ref[pl.ds(k, t_out), :], w_ref[k],
                                preferred_element_type=jnp.float32)
        return jnp.maximum(acc + b_ref[...], 0.0)            # (t_out, F) f32

    # conv1: single im2col matmul (contraction K1*E) + ReLU + maxpool3
    p1 = s1_ref.shape[0]
    y1 = jnp.dot(x_ref[0], w1_ref[...], preferred_element_type=jnp.float32)
    y1 = jnp.maximum(y1 + b1_ref[...], 0.0)
    s1_ref[...] = pool3(y1, p1).astype(cdt)

    # conv2 + ReLU + maxpool3
    t2 = p1 - w2_ref.shape[0] + 1
    p2 = s2_ref.shape[0]
    y2 = conv_relu(s1_ref, w2_ref, b2_ref, t2)
    s2_ref[...] = pool3(y2, p2).astype(cdt)

    # conv3 + ReLU
    t3 = s3_ref.shape[0]
    s3_ref[...] = conv_relu(s2_ref, w3_ref, b3_ref, t3).astype(cdt)

    # conv4 + ReLU, written straight to the (lane-dense, F-fastest) output block
    t4 = o_ref.shape[1]
    o_ref[0] = conv_relu(s3_ref, w4_ref, b4_ref, t4).astype(cdt)


def conv_stack(x_im2col, w1_2d, w2, w3, w4, b1, b2, b3, b4):
    """x_im2col: (B, T1, K1*E) bf16 -> conv4 output (B, T4, F) bf16."""
    B, T1, KE = x_im2col.shape
    F = w1_2d.shape[1]
    P1 = T1 // 3
    T2 = P1 - w2.shape[0] + 1
    P2 = T2 // 3
    T3 = P2 - w3.shape[0] + 1
    T4 = T3 - w4.shape[0] + 1
    assert min(P1, T2, P2, T3, T4) >= 1, "sequence too short for the conv stack"

    dt = x_im2col.dtype
    return pl.pallas_call(
        _conv_stack_kernel,
        out_shape=jax.ShapeDtypeStruct((B, T4, F), dt),
        grid=(B,),
        in_specs=[
            pl.BlockSpec((1, T1, KE), lambda b: (b, 0, 0)),
            _const_spec((KE, F)),
            _const_spec(w2.shape),
            _const_spec(w3.shape),
            _const_spec(w4.shape),
            _const_spec((1, F)),
            _const_spec((1, F)),
            _const_spec((1, F)),
            _const_spec((1, F)),
        ],
        out_specs=pl.BlockSpec((1, T4, F), lambda b: (b, 0, 0)),
        scratch_shapes=[
            pltpu.VMEM((T1, F), jnp.float32),   # maxpool staging (f32)
            pltpu.VMEM((P1, F), dt),            # pooled conv1
            pltpu.VMEM((P2, F), dt),            # pooled conv2
            pltpu.VMEM((T3, F), dt),            # conv3
        ],
        compiler_params=pltpu.CompilerParams(
            dimension_semantics=("parallel",),
            vmem_limit_bytes=48 * 1024 * 1024,   # fits v7x 64 MiB; raise on v5e/v6e
        ),
    )(x_im2col, w1_2d, w2, w3, w4,
      b1.reshape(1, F), b2.reshape(1, F), b3.reshape(1, F), b4.reshape(1, F))


# ---------------------------------------------------------------------------
# Kernel 2: tiled linear (+ReLU) with f32 accumulator -- used for fc1 AND fc2.
# ---------------------------------------------------------------------------
def _linear_kernel(x_ref, w_ref, b_ref, o_ref, acc_ref, *, relu):
    @pl.when(pl.program_id(1) == 0)
    def _():
        acc_ref[...] = jnp.zeros_like(acc_ref)

    acc_ref[...] += jnp.dot(x_ref[...], w_ref[...],
                            preferred_element_type=jnp.float32)

    @pl.when(pl.program_id(1) == pl.num_programs(1) - 1)
    def _():
        y = acc_ref[...] + b_ref[...]
        if relu:
            y = jnp.maximum(y, 0.0)
        o_ref[...] = y.astype(o_ref.dtype)


def _pick_tile(dim, target):
    """Largest tile <= target that divides dim (multiples of 128 only; else full dim)."""
    if dim <= target:
        return dim
    best = dim
    for t in range(128, target + 1, 128):
        if dim % t == 0:
            best = t
    return best


def linear_tiled(x, w, b, *, relu, tn_target=512, tk_target=3072):
    """y = relu?(x @ w + b).  x:(B,Din) bf16, w:(Din,Dout) bf16, b:(Dout,) f32.

    Grid (Dout//tn, Din//tk), f32 VMEM accumulator, pl.when init/finalize.
    Large tiles (<=512 x 3072; 39936 and 2048 are divisible) -> at real scale
    the fc1 grid is ~52 steps instead of ~5000, the weight tile (3 MiB bf16,
    double-buffered) hides behind the matmul, and the (B, tk) x-block is only
    re-fetched Dout/tn = 4 times.
    """
    B, D_in = x.shape
    D_out = w.shape[1]
    tn = _pick_tile(D_out, tn_target)
    tk = _pick_tile(D_in, tk_target)
    return pl.pallas_call(
        functools.partial(_linear_kernel, relu=relu),
        out_shape=jax.ShapeDtypeStruct((B, D_out), x.dtype),
        grid=(D_out // tn, D_in // tk),
        in_specs=[
            pl.BlockSpec((B, tk), lambda n, k: (0, k)),
            pl.BlockSpec((tk, tn), lambda n, k: (k, n)),
            pl.BlockSpec((1, tn), lambda n, k: (0, n)),
        ],
        out_specs=pl.BlockSpec((B, tn), lambda n, k: (0, n)),
        scratch_shapes=[pltpu.VMEM((B, tn), jnp.float32)],
        compiler_params=pltpu.CompilerParams(
            dimension_semantics=("parallel", "arbitrary"),
            vmem_limit_bytes=48 * 1024 * 1024,
        ),
    )(x, w, b.reshape(1, D_out))


# ---------------------------------------------------------------------------
# Kernel 3: fc3 + LogSoftmax head (tiny: weight is (hidden, 2)).
# ---------------------------------------------------------------------------
def _head_kernel(x_ref, w_ref, b_ref, o_ref):
    logits = jnp.dot(x_ref[...], w_ref[...], preferred_element_type=jnp.float32)
    logits = logits + b_ref[...]
    m = jnp.max(logits, axis=-1, keepdims=True)
    z = logits - m
    lse = jnp.log(jnp.sum(jnp.exp(z), axis=-1, keepdims=True))
    o_ref[...] = z - lse


def head_logsoftmax(x, w, b):
    B = x.shape[0]
    ncls = w.shape[1]
    return pl.pallas_call(
        _head_kernel,
        out_shape=jax.ShapeDtypeStruct((B, ncls), jnp.float32),
    )(x, w, b.reshape(1, ncls))


# ---------------------------------------------------------------------------
# CharCNN forward (Pallas-backed)
# ---------------------------------------------------------------------------
def char_cnn_forward(params, token_ids):
    cdt = jnp.bfloat16
    # Embedding lookup (gather) -- plain-JAX glue; activations in bf16.
    # TODO(synk): the char-embedding gather has no clean Pallas equivalent; kept in JAX.
    x = params["emb"].astype(cdt)[token_ids]                       # (B, L, E)

    # Wrapper-side im2col for conv1 (layout plumbing, not compute): one matmul
    # with contraction K1*E instead of K1 tiny-contraction tap matmuls.
    K1, E, F = params["w1"].shape
    L = x.shape[1]
    T1 = L - K1 + 1
    x_im2col = jnp.concatenate([x[:, k:k + T1, :] for k in range(K1)], axis=-1)
    w1_2d = params["w1"].astype(cdt).reshape(K1 * E, F)

    # Fused conv1..conv4 + both maxpools (one pallas_call, one batch row per step).
    y = conv_stack(x_im2col, w1_2d,
                   params["w2"].astype(cdt), params["w3"].astype(cdt),
                   params["w4"].astype(cdt),
                   params["b1"], params["b2"], params["b3"], params["b4"])
    # flatten matches torch transpose(1,3) + contiguous().view(B, -1): channel fastest
    feats = y.reshape(y.shape[0], -1)                              # (B, T4*F)

    # fc1 / fc2: tiled matmuls with fused ReLU (Dropout(0.5) is identity in eval).
    h = linear_tiled(feats, params["fc1_w"].astype(cdt), params["fc1_b"], relu=True)
    h = linear_tiled(h, params["fc2_w"].astype(cdt), params["fc2_b"], relu=True)

    # fc3 + LogSoftmax.
    return head_logsoftmax(h, params["fc3_w"].astype(cdt), params["fc3_b"])


# ---------------------------------------------------------------------------
# Pure-JAX (f32) reference for verification
# ---------------------------------------------------------------------------
def _ref_conv_relu(x, w, b):
    K = w.shape[0]
    T_out = x.shape[1] - K + 1
    acc = jnp.zeros((x.shape[0], T_out, w.shape[2]), jnp.float32)
    for k in range(K):
        acc = acc + jnp.einsum("btc,cf->btf", x[:, k:k + T_out, :], w[k])
    return jnp.maximum(acc + b, 0.0)


def _ref_maxpool3(x):
    B, T, F = x.shape
    Tp = T // 3
    return x[:, : 3 * Tp].reshape(B, Tp, 3, F).max(axis=2)


def char_cnn_reference(params, token_ids):
    x = params["emb"][token_ids]
    x = _ref_conv_relu(x, params["w1"], params["b1"])
    x = _ref_maxpool3(x)
    x = _ref_conv_relu(x, params["w2"], params["b2"])
    x = _ref_maxpool3(x)
    x = _ref_conv_relu(x, params["w3"], params["b3"])
    x = _ref_conv_relu(x, params["w4"], params["b4"])
    x = x.reshape(x.shape[0], -1)
    x = jnp.maximum(x @ params["fc1_w"] + params["fc1_b"], 0.0)
    x = jnp.maximum(x @ params["fc2_w"] + params["fc2_b"], 0.0)
    logits = x @ params["fc3_w"] + params["fc3_b"]
    return jax.nn.log_softmax(logits, axis=-1)


# ---------------------------------------------------------------------------
# main
# ---------------------------------------------------------------------------
if __name__ == "__main__":
    # Small, self-consistent shapes (original uses L=400, n_filter=1024,
    # fc1_in=39936, hidden=2048, 2 classes).
    B = 16         # batch  -> conv grid of 16 (>= 2 steps per TC on v7x)
    L = 64         # char-sequence length
    V = 32         # vocabulary size
    E = 16         # num_features == embedding dim == conv1 kernel width
    F = 128        # n_filter (scaled down from 1024)
    HID = 256      # fc hidden (scaled down from 2048)
    NCLS = 2

    # seq trace: 64 -conv1(5)-> 60 -pool3-> 20 -conv2(3)-> 18 -pool3-> 6
    #            -conv3(3)-> 4 -conv4(3)-> 2   => flat = 2 * F = 256
    flat_dim = 2 * F

    key = jax.random.PRNGKey(0)
    ks = jax.random.split(key, 16)
    s = 0.05
    params = {
        "emb":   jax.random.normal(ks[0], (V, E), jnp.float32),
        "w1":    jax.random.normal(ks[1], (5, E, F), jnp.float32) * s,
        "b1":    jax.random.normal(ks[2], (F,), jnp.float32) * s,
        "w2":    jax.random.normal(ks[3], (3, F, F), jnp.float32) * s,
        "b2":    jax.random.normal(ks[4], (F,), jnp.float32) * s,
        "w3":    jax.random.normal(ks[5], (3, F, F), jnp.float32) * s,
        "b3":    jax.random.normal(ks[6], (F,), jnp.float32) * s,
        "w4":    jax.random.normal(ks[7], (3, F, F), jnp.float32) * s,
        "b4":    jax.random.normal(ks[8], (F,), jnp.float32) * s,
        "fc1_w": jax.random.normal(ks[9], (flat_dim, HID), jnp.float32) * s,
        "fc1_b": jax.random.normal(ks[10], (HID,), jnp.float32) * s,
        "fc2_w": jax.random.normal(ks[11], (HID, HID), jnp.float32) * s,
        "fc2_b": jax.random.normal(ks[12], (HID,), jnp.float32) * s,
        "fc3_w": jax.random.normal(ks[13], (HID, NCLS), jnp.float32) * s,
        "fc3_b": jax.random.normal(ks[14], (NCLS,), jnp.float32) * s,
    }

    token_ids = jax.random.randint(ks[15], (B, L), 0, V, dtype=jnp.int32)

    _probe_buffered_one()   # probe outside of the jit trace (result is cached)

    out = jax.jit(char_cnn_forward)(params, token_ids)
    out = jax.block_until_ready(out)

    ref = char_cnn_reference(params, token_ids)
    assert out.shape == (B, NCLS)
    # Kernels run bf16 weights/activations with f32 accumulation, so tolerance vs
    # the f32 reference is loosened accordingly.
    assert jnp.allclose(out, ref, atol=3e-2, rtol=3e-2), "mismatch vs reference"

    print("KERNEL_OK")
</pallas_src>

<mosaic_0001>
module attributes {stable_mosaic.version = 11 : i64} {
  func.func @_k(%arg0: i32, %arg1: memref<8x128xf32, #tpu.memory_space<vmem>>, %arg2: memref<8x128xf32, #tpu.memory_space<vmem>>) attributes {dimension_semantics = [#tpu.dimension_semantics<arbitrary>], iteration_bounds = array<i64: 2>, scalar_prefetch = 0 : i64, scratch_operands = 0 : i64, tpu.core_type = #tpu.core_type<tc>, window_params = [{pipeline_mode = #tpu.pipeline_mode<synchronous>, transform_indices = @transform_0, window_bounds = array<i64: 8, 128>}, {pipeline_mode = #tpu.pipeline_mode<synchronous>, transform_indices = @transform_1, window_bounds = array<i64: 8, 128>}]} {
    %c0 = arith.constant 0 : index
    %c0_0 = arith.constant 0 : index
    %0 = vector.load %arg1[%c0, %c0_0] : memref<8x128xf32, #tpu.memory_space<vmem>>, vector<8x128xf32>
    %cst = arith.constant 1.000000e+00 : f32
    %1 = vector.broadcast %cst : f32 to vector<8x128xf32>
    %2 = arith.addf %0, %1 : vector<8x128xf32>
    %c0_1 = arith.constant 0 : index
    %c0_2 = arith.constant 0 : index
    %3 = vector.load %arg2[%c0_1, %c0_2] : memref<8x128xf32, #tpu.memory_space<vmem>>, vector<8x128xf32>
    tpu.vector_store %arg2[%c0_1, %c0_2], %2 {strides = array<i32>} : memref<8x128xf32, #tpu.memory_space<vmem>>, vector<8x128xf32>,
    return
  }
  func.func @transform_0(%arg0: i32) -> (i32, i32) {
    %c0_i32 = arith.constant 0 : i32
    %c0_i32_0 = arith.constant 0 : i32
    %c0_i32_1 = arith.constant 0 : i32
    return %c0_i32, %c0_i32_0 : i32, i32
  }
  func.func @transform_1(%arg0: i32) -> (i32, i32) {
    %c0_i32 = arith.constant 0 : i32
    %c0_i32_0 = arith.constant 0 : i32
    %c0_i32_1 = arith.constant 0 : i32
    return %c0_i32, %c0_i32_0 : i32, i32
  }
}

module attributes {stable_mosaic.version = 11 : i64} {
  func.func @_conv_stack_kernel(%arg0: i32, %arg1: memref<1x60x80xbf16, #tpu.memory_space<vmem>>, %arg2: memref<80x128xbf16, #tpu.memory_space<vmem>>, %arg3: memref<3x128x128xbf16, #tpu.memory_space<vmem>>, %arg4: memref<3x128x128xbf16, #tpu.memory_space<vmem>>, %arg5: memref<3x128x128xbf16, #tpu.memory_space<vmem>>, %arg6: memref<1x128xf32, #tpu.memory_space<vmem>>, %arg7: memref<1x128xf32, #tpu.memory_space<vmem>>, %arg8: memref<1x128xf32, #tpu.memory_space<vmem>>, %arg9: memref<1x128xf32, #tpu.memory_space<vmem>>, %arg10: memref<1x2x128xbf16, #tpu.memory_space<vmem>>, %arg11: memref<60x128xf32, #tpu.memory_space<vmem>>, %arg12: memref<20x128xbf16, #tpu.memory_space<vmem>>, %arg13: memref<6x128xbf16, #tpu.memory_space<vmem>>, %arg14: memref<4x128xbf16, #tpu.memory_space<vmem>>) attributes {dimension_semantics = [#tpu.dimension_semantics<parallel>], iteration_bounds = array<i64: 16>, scalar_prefetch = 0 : i64, scratch_operands = 4 : i64, tpu.core_type = #tpu.core_type<tc>, window_params = [{transform_indices = @transform_0, window_bounds = array<i64: 1, 60, 80>}, {pipeline_mode = #tpu.pipeline_mode<synchronous>, transform_indices = @transform_1, window_bounds = array<i64: 80, 128>}, {pipeline_mode = #tpu.pipeline_mode<synchronous>, transform_indices = @transform_2, window_bounds = array<i64: 3, 128, 128>}, {pipeline_mode = #tpu.pipeline_mode<synchronous>, transform_indices = @transform_3, window_bounds = array<i64: 3, 128, 128>}, {pipeline_mode = #tpu.pipeline_mode<synchronous>, transform_indices = @transform_4, window_bounds = array<i64: 3, 128, 128>}, {pipeline_mode = #tpu.pipeline_mode<synchronous>, transform_indices = @transform_5, window_bounds = array<i64: 1, 128>}, {pipeline_mode = #tpu.pipeline_mode<synchronous>, transform_indices = @transform_6, window_bounds = array<i64: 1, 128>}, {pipeline_mode = #tpu.pipeline_mode<synchronous>, transform_indices = @transform_7, window_bounds = array<i64: 1, 128>}, {pipeline_mode = #tpu.pipeline_mode<synchronous>, transform_indices = @transform_8, window_bounds = array<i64: 1, 128>}, {transform_indices = @transform_9, window_bounds = array<i64: 1, 2, 128>}]} {
    %c0 = arith.constant 0 : index
    %c0_0 = arith.constant 0 : index
    %c0_1 = arith.constant 0 : index
    %0 = vector.load %arg1[%c0, %c0_0, %c0_1] : memref<1x60x80xbf16, #tpu.memory_space<vmem>>, vector<1x60x80xbf16>
    %1 = vector.shape_cast %0 : vector<1x60x80xbf16> to vector<60x80xbf16>
    %c0_2 = arith.constant 0 : index
    %c0_3 = arith.constant 0 : index
    %2 = vector.load %arg2[%c0_2, %c0_3] : memref<80x128xbf16, #tpu.memory_space<vmem>>, vector<80x128xbf16>
    %cst = arith.constant dense<0.000000e+00> : vector<60x128xf32>
    %3 = tpu.matmul %1, %2, %cst {dimension_numbers = #tpu.dot_dimension_numbers<[1], [0], [0], [1], [0, 0, 1, 1], [], []>} : vector<60x80xbf16>, vector<80x128xbf16>, vector<60x128xf32> -> vector<60x128xf32>
    %c0_4 = arith.constant 0 : index
    %c0_5 = arith.constant 0 : index
    %4 = vector.load %arg6[%c0_4, %c0_5] : memref<1x128xf32, #tpu.memory_space<vmem>>, vector<1x128xf32>
    %5 = vector.broadcast %4 : vector<1x128xf32> to vector<60x128xf32>
    %6 = arith.addf %3, %5 : vector<60x128xf32>
    %cst_6 = arith.constant 0.000000e+00 : f32
    %7 = vector.broadcast %cst_6 : f32 to vector<60x128xf32>
    %8 = arith.maximumf %6, %7 : vector<60x128xf32>
    %c0_7 = arith.constant 0 : index
    %c0_8 = arith.constant 0 : index
    %9 = vector.load %arg11[%c0_7, %c0_8] : memref<60x128xf32, #tpu.memory_space<vmem>>, vector<60x128xf32>
    tpu.vector_store %arg11[%c0_7, %c0_8], %8 {strides = array<i32>} : memref<60x128xf32, #tpu.memory_space<vmem>>, vector<60x128xf32>,
    %c0_9 = arith.constant 0 : index
    %c0_10 = arith.constant 0 : index
    %10 = tpu.strided_load %arg11[%c0_9, %c0_10] {strides = array<i32: 3, 1>} : memref<60x128xf32, #tpu.memory_space<vmem>>, vector<20x128xf32>
    %c1 = arith.constant 1 : index
    %c0_11 = arith.constant 0 : index
    %11 = tpu.strided_load %arg11[%c1, %c0_11] {strides = array<i32: 3, 1>} : memref<60x128xf32, #tpu.memory_space<vmem>>, vector<20x128xf32>
    %c2 = arith.constant 2 : index
    %c0_12 = arith.constant 0 : index
    %12 = tpu.strided_load %arg11[%c2, %c0_12] {strides = array<i32: 3, 1>} : memref<60x128xf32, #tpu.memory_space<vmem>>, vector<20x128xf32>
    %13 = arith.maximumf %10, %11 : vector<20x128xf32>
    %14 = arith.maximumf %13, %12 : vector<20x128xf32>
    %15 = arith.truncf %14 : vector<20x128xf32> to vector<20x128xbf16>
    %c0_13 = arith.constant 0 : index
    %c0_14 = arith.constant 0 : index
    %16 = vector.load %arg12[%c0_13, %c0_14] : memref<20x128xbf16, #tpu.memory_space<vmem>>, vector<20x128xbf16>
    tpu.vector_store %arg12[%c0_13, %c0_14], %15 {strides = array<i32>} : memref<20x128xbf16, #tpu.memory_space<vmem>>, vector<20x128xbf16>,
    %c0_15 = arith.constant 0 : index
    %c0_16 = arith.constant 0 : index
    %17 = vector.load %arg12[%c0_15, %c0_16] : memref<20x128xbf16, #tpu.memory_space<vmem>>, vector<18x128xbf16>
    %c0_17 = arith.constant 0 : index
    %c0_18 = arith.constant 0 : index
    %c0_19 = arith.constant 0 : index
    %18 = vector.load %arg3[%c0_17, %c0_18, %c0_19] : memref<3x128x128xbf16, #tpu.memory_space<vmem>>, vector<1x128x128xbf16>
    %19 = vector.shape_cast %18 : vector<1x128x128xbf16> to vector<128x128xbf16>
    %cst_20 = arith.constant dense<0.000000e+00> : vector<18x128xf32>
    %20 = tpu.matmul %17, %19, %cst_20 {dimension_numbers = #tpu.dot_dimension_numbers<[1], [0], [0], [1], [0, 0, 1, 1], [], []>} : vector<18x128xbf16>, vector<128x128xbf16>, vector<18x128xf32> -> vector<18x128xf32>
    %c1_21 = arith.constant 1 : index
    %c0_22 = arith.constant 0 : index
    %21 = vector.load %arg12[%c1_21, %c0_22] : memref<20x128xbf16, #tpu.memory_space<vmem>>, vector<18x128xbf16>
    %c1_23 = arith.constant 1 : index
    %c0_24 = arith.constant 0 : index
    %c0_25 = arith.constant 0 : index
    %22 = vector.load %arg3[%c1_23, %c0_24, %c0_25] : memref<3x128x128xbf16, #tpu.memory_space<vmem>>, vector<1x128x128xbf16>
    %23 = vector.shape_cast %22 : vector<1x128x128xbf16> to vector<128x128xbf16>
    %cst_26 = arith.constant dense<0.000000e+00> : vector<18x128xf32>
    %24 = tpu.matmul %21, %23, %cst_26 {dimension_numbers = #tpu.dot_dimension_numbers<[1], [0], [0], [1], [0, 0, 1, 1], [], []>} : vector<18x128xbf16>, vector<128x128xbf16>, vector<18x128xf32> -> vector<18x128xf32>
    %25 = arith.addf %20, %24 : vector<18x128xf32>
    %c2_27 = arith.constant 2 : index
    %c0_28 = arith.constant 0 : index
    %26 = vector.load %arg12[%c2_27, %c0_28] : memref<20x128xbf16, #tpu.memory_space<vmem>>, vector<18x128xbf16>
    %c2_29 = arith.constant 2 : index
    %c0_30 = arith.constant 0 : index
    %c0_31 = arith.constant 0 : index
    %27 = vector.load %arg3[%c2_29, %c0_30, %c0_31] : memref<3x128x128xbf16, #tpu.memory_space<vmem>>, vector<1x128x128xbf16>
    %28 = vector.shape_cast %27 : vector<1x128x128xbf16> to vector<128x128xbf16>
    %cst_32 = arith.constant dense<0.000000e+00> : vector<18x128xf32>
    %29 = tpu.matmul %26, %28, %cst_32 {dimension_numbers = #tpu.dot_dimension_numbers<[1], [0], [0], [1], [0, 0, 1, 1], [], []>} : vector<18x128xbf16>, vector<128x128xbf16>, vector<18x128xf32> -> vector<18x128xf32>
    %30 = arith.addf %25, %29 : vector<18x128xf32>
    %c0_33 = arith.constant 0 : index
    %c0_34 = arith.constant 0 : index
    %31 = vector.load %arg7[%c0_33, %c0_34] : memref<1x128xf32, #tpu.memory_space<vmem>>, vector<1x128xf32>
    %32 = vector.broadcast %31 : vector<1x128xf32> to vector<18x128xf32>
    %33 = arith.addf %30, %32 : vector<18x128xf32>
    %cst_35 = arith.constant 0.000000e+00 : f32
    %34 = vector.broadcast %cst_35 : f32 to vector<18x128xf32>
    %35 = arith.maximumf %33, %34 : vector<18x128xf32>
    %c0_36 = arith.constant 0 : index
    %c0_37 = arith.constant 0 : index
    %36 = vector.load %arg11[%c0_36, %c0_37] : memref<60x128xf32, #tpu.memory_space<vmem>>, vector<18x128xf32>
    tpu.vector_store %arg11[%c0_36, %c0_37], %35 {strides = array<i32>} : memref<60x128xf32, #tpu.memory_space<vmem>>, vector<18x128xf32>,
    %c0_38 = arith.constant 0 : index
    %c0_39 = arith.constant 0 : index
    %37 = tpu.strided_load %arg11[%c0_38, %c0_39] {strides = array<i32: 3, 1>} : memref<60x128xf32, #tpu.memory_space<vmem>>, vector<6x128xf32>
    %c1_40 = arith.constant 1 : index
    %c0_41 = arith.constant 0 : index
    %38 = tpu.strided_load %arg11[%c1_40, %c0_41] {strides = array<i32: 3, 1>} : memref<60x128xf32, #tpu.memory_space<vmem>>, vector<6x128xf32>
    %c2_42 = arith.constant 2 : index
    %c0_43 = arith.constant 0 : index
    %39 = tpu.strided_load %arg11[%c2_42, %c0_43] {strides = array<i32: 3, 1>} : memref<60x128xf32, #tpu.memory_space<vmem>>, vector<6x128xf32>
    %40 = arith.maximumf %37, %38 : vector<6x128xf32>
    %41 = arith.maximumf %40, %39 : vector<6x128xf32>
    %42 = arith.truncf %41 : vector<6x128xf32> to vector<6x128xbf16>
    %c0_44 = arith.constant 0 : index
    %c0_45 = arith.constant 0 : index
    %43 = vector.load %arg13[%c0_44, %c0_45] : memref<6x128xbf16, #tpu.memory_space<vmem>>, vector<6x128xbf16>
    tpu.vector_store %arg13[%c0_44, %c0_45], %42 {strides = array<i32>} : memref<6x128xbf16, #tpu.memory_space<vmem>>, vector<6x128xbf16>,
    %c0_46 = arith.constant 0 : index
    %c0_47 = arith.constant 0 : index
    %44 = vector.load %arg13[%c0_46, %c0_47] : memref<6x128xbf16, #tpu.memory_space<vmem>>, vector<4x128xbf16>
    %c0_48 = arith.constant 0 : index
    %c0_49 = arith.constant 0 : index
    %c0_50 = arith.constant 0 : index
    %45 = vector.load %arg4[%c0_48, %c0_49, %c0_50] : memref<3x128x128xbf16, #tpu.memory_space<vmem>>, vector<1x128x128xbf16>
    %46 = vector.shape_cast %45 : vector<1x128x128xbf16> to vector<128x128xbf16>
    %cst_51 = arith.constant dense<0.000000e+00> : vector<4x128xf32>
    %47 = tpu.matmul %44, %46, %cst_51 {dimension_numbers = #tpu.dot_dimension_numbers<[1], [0], [0], [1], [0, 0, 1, 1], [], []>} : vector<4x128xbf16>, vector<128x128xbf16>, vector<4x128xf32> -> vector<4x128xf32>
    %c1_52 = arith.constant 1 : index
    %c0_53 = arith.constant 0 : index
    %48 = vector.load %arg13[%c1_52, %c0_53] : memref<6x128xbf16, #tpu.memory_space<vmem>>, vector<4x128xbf16>
    %c1_54 = arith.constant 1 : index
    %c0_55 = arith.constant 0 : index
    %c0_56 = arith.constant 0 : index
    %49 = vector.load %arg4[%c1_54, %c0_55, %c0_56] : memref<3x128x128xbf16, #tpu.memory_space<vmem>>, vector<1x128x128xbf16>
    %50 = vector.shape_cast %49 : vector<1x128x128xbf16> to vector<128x128xbf16>
    %cst_57 = arith.constant dense<0.000000e+00> : vector<4x128xf32>
    %51 = tpu.matmul %48, %50, %cst_57 {dimension_numbers = #tpu.dot_dimension_numbers<[1], [0], [0], [1], [0, 0, 1, 1], [], []>} : vector<4x128xbf16>, vector<128x128xbf16>, vector<4x128xf32> -> vector<4x128xf32>
    %52 = arith.addf %47, %51 : vector<4x128xf32>
    %c2_58 = arith.constant 2 : index
    %c0_59 = arith.constant 0 : index
    %53 = vector.load %arg13[%c2_58, %c0_59] : memref<6x128xbf16, #tpu.memory_space<vmem>>, vector<4x128xbf16>
    %c2_60 = arith.constant 2 : index
    %c0_61 = arith.constant 0 : index
    %c0_62 = arith.constant 0 : index
    %54 = vector.load %arg4[%c2_60, %c0_61, %c0_62] : memref<3x128x128xbf16, #tpu.memory_space<vmem>>, vector<1x128x128xbf16>
    %55 = vector.shape_cast %54 : vector<1x128x128xbf16> to vector<128x128xbf16>
    %cst_63 = arith.constant dense<0.000000e+00> : vector<4x128xf32>
    %56 = tpu.matmul %53, %55, %cst_63 {dimension_numbers = #tpu.dot_dimension_numbers<[1], [0], [0], [1], [0, 0, 1, 1], [], []>} : vector<4x128xbf16>, vector<128x128xbf16>, vector<4x128xf32> -> vector<4x128xf32>
    %57 = arith.addf %52, %56 : vector<4x128xf32>
    %c0_64 = arith.constant 0 : index
    %c0_65 = arith.constant 0 : index
    %58 = vector.load %arg8[%c0_64, %c0_65] : memref<1x128xf32, #tpu.memory_space<vmem>>, vector<1x128xf32>
    %59 = vector.broadcast %58 : vector<1x128xf32> to vector<4x128xf32>
    %60 = arith.addf %57, %59 : vector<4x128xf32>
    %cst_66 = arith.constant 0.000000e+00 : f32
    %61 = vector.broadcast %cst_66 : f32 to vector<4x128xf32>
    %62 = arith.maximumf %60, %61 : vector<4x128xf32>
    %63 = arith.truncf %62 : vector<4x128xf32> to vector<4x128xbf16>
    %c0_67 = arith.constant 0 : index
    %c0_68 = arith.constant 0 : index
    %64 = vector.load %arg14[%c0_67, %c0_68] : memref<4x128xbf16, #tpu.memory_space<vmem>>, vector<4x128xbf16>
    tpu.vector_store %arg14[%c0_67, %c0_68], %63 {strides = array<i32>} : memref<4x128xbf16, #tpu.memory_space<vmem>>, vector<4x128xbf16>,
    %c0_69 = arith.constant 0 : index
    %c0_70 = arith.constant 0 : index
    %65 = vector.load %arg14[%c0_69, %c0_70] : memref<4x128xbf16, #tpu.memory_space<vmem>>, vector<2x128xbf16>
    %c0_71 = arith.constant 0 : index
    %c0_72 = arith.constant 0 : index
    %c0_73 = arith.constant 0 : index
    %66 = vector.load %arg5[%c0_71, %c0_72, %c0_73] : memref<3x128x128xbf16, #tpu.memory_space<vmem>>, vector<1x128x128xbf16>
    %67 = vector.shape_cast %66 : vector<1x128x128xbf16> to vector<128x128xbf16>
    %cst_74 = arith.constant dense<0.000000e+00> : vector<2x128xf32>
    %68 = tpu.matmul %65, %67, %cst_74 {dimension_numbers = #tpu.dot_dimension_numbers<[1], [0], [0], [1], [0, 0, 1, 1], [], []>} : vector<2x128xbf16>, vector<128x128xbf16>, vector<2x128xf32> -> vector<2x128xf32>
    %c1_75 = arith.constant 1 : index
    %c0_76 = arith.constant 0 : index
    %69 = vector.load %arg14[%c1_75, %c0_76] : memref<4x128xbf16, #tpu.memory_space<vmem>>, vector<2x128xbf16>
    %c1_77 = arith.constant 1 : index
    %c0_78 = arith.constant 0 : index
    %c0_79 = arith.constant 0 : index
    %70 = vector.load %arg5[%c1_77, %c0_78, %c0_79] : memref<3x128x128xbf16, #tpu.memory_space<vmem>>, vector<1x128x128xbf16>
    %71 = vector.shape_cast %70 : vector<1x128x128xbf16> to vector<128x128xbf16>
    %cst_80 = arith.constant dense<0.000000e+00> : vector<2x128xf32>
    %72 = tpu.matmul %69, %71, %cst_80 {dimension_numbers = #tpu.dot_dimension_numbers<[1], [0], [0], [1], [0, 0, 1, 1], [], []>} : vector<2x128xbf16>, vector<128x128xbf16>, vector<2x128xf32> -> vector<2x128xf32>
    %73 = arith.addf %68, %72 : vector<2x128xf32>
    %c2_81 = arith.constant 2 : index
    %c0_82 = arith.constant 0 : index
    %74 = vector.load %arg14[%c2_81, %c0_82] : memref<4x128xbf16, #tpu.memory_space<vmem>>, vector<2x128xbf16>
    %c2_83 = arith.constant 2 : index
    %c0_84 = arith.constant 0 : index
    %c0_85 = arith.constant 0 : index
    %75 = vector.load %arg5[%c2_83, %c0_84, %c0_85] : memref<3x128x128xbf16, #tpu.memory_space<vmem>>, vector<1x128x128xbf16>
    %76 = vector.shape_cast %75 : vector<1x128x128xbf16> to vector<128x128xbf16>
    %cst_86 = arith.constant dense<0.000000e+00> : vector<2x128xf32>
    %77 = tpu.matmul %74, %76, %cst_86 {dimension_numbers = #tpu.dot_dimension_numbers<[1], [0], [0], [1], [0, 0, 1, 1], [], []>} : vector<2x128xbf16>, vector<128x128xbf16>, vector<2x128xf32> -> vector<2x128xf32>
    %78 = arith.addf %73, %77 : vector<2x128xf32>
    %c0_87 = arith.constant 0 : index
    %c0_88 = arith.constant 0 : index
    %79 = vector.load %arg9[%c0_87, %c0_88] : memref<1x128xf32, #tpu.memory_space<vmem>>, vector<1x128xf32>
    %80 = vector.broadcast %79 : vector<1x128xf32> to vector<2x128xf32>
    %81 = arith.addf %78, %80 : vector<2x128xf32>
    %cst_89 = arith.constant 0.000000e+00 : f32
    %82 = vector.broadcast %cst_89 : f32 to vector<2x128xf32>
    %83 = arith.maximumf %81, %82 : vector<2x128xf32>
    %84 = arith.truncf %83 : vector<2x128xf32> to vector<2x128xbf16>
    %c0_90 = arith.constant 0 : index
    %c0_91 = arith.constant 0 : index
    %c0_92 = arith.constant 0 : index
    %85 = vector.load %arg10[%c0_90, %c0_91, %c0_92] : memref<1x2x128xbf16, #tpu.memory_space<vmem>>, vector<1x2x128xbf16>
    %86 = vector.shape_cast %85 : vector<1x2x128xbf16> to vector<2x128xbf16>
    %87 = vector.shape_cast %84 : vector<2x128xbf16> to vector<1x2x128xbf16>
    tpu.vector_store %arg10[%c0_90, %c0_91, %c0_92], %87 {strides = array<i32>} : memref<1x2x128xbf16, #tpu.memory_space<vmem>>, vector<1x2x128xbf16>,
    return
  }
  func.func @transform_0(%arg0: i32) -> (i32, i32, i32) {
    %c0_i32 = arith.constant 0 : i32
    %c0_i32_0 = arith.constant 0 : i32
    %c0_i32_1 = arith.constant 0 : i32
    return %arg0, %c0_i32, %c0_i32_0 : i32, i32, i32
  }
  func.func @transform_1(%arg0: i32) -> (i32, i32) {
    %c0_i32 = arith.constant 0 : i32
    %c0_i32_0 = arith.constant 0 : i32
    %c0_i32_1 = arith.constant 0 : i32
    return %c0_i32, %c0_i32_0 : i32, i32
  }
  func.func @transform_2(%arg0: i32) -> (i32, i32, i32) {
    %c0_i32 = arith.constant 0 : i32
    %c0_i32_0 = arith.constant 0 : i32
    %c0_i32_1 = arith.constant 0 : i32
    %c0_i32_2 = arith.constant 0 : i32
    return %c0_i32, %c0_i32_0, %c0_i32_1 : i32, i32, i32
  }
  func.func @transform_3(%arg0: i32) -> (i32, i32, i32) {
    %c0_i32 = arith.constant 0 : i32
    %c0_i32_0 = arith.constant 0 : i32
    %c0_i32_1 = arith.constant 0 : i32
    %c0_i32_2 = arith.constant 0 : i32
    return %c0_i32, %c0_i32_0, %c0_i32_1 : i32, i32, i32
  }
  func.func @transform_4(%arg0: i32) -> (i32, i32, i32) {
    %c0_i32 = arith.constant 0 : i32
    %c0_i32_0 = arith.constant 0 : i32
    %c0_i32_1 = arith.constant 0 : i32
    %c0_i32_2 = arith.constant 0 : i32
    return %c0_i32, %c0_i32_0, %c0_i32_1 : i32, i32, i32
  }
  func.func @transform_5(%arg0: i32) -> (i32, i32) {
    %c0_i32 = arith.constant 0 : i32
    %c0_i32_0 = arith.constant 0 : i32
    %c0_i32_1 = arith.constant 0 : i32
    return %c0_i32, %c0_i32_0 : i32, i32
  }
  func.func @transform_6(%arg0: i32) -> (i32, i32) {
    %c0_i32 = arith.constant 0 : i32
    %c0_i32_0 = arith.constant 0 : i32
    %c0_i32_1 = arith.constant 0 : i32
    return %c0_i32, %c0_i32_0 : i32, i32
  }
  func.func @transform_7(%arg0: i32) -> (i32, i32) {
    %c0_i32 = arith.constant 0 : i32
    %c0_i32_0 = arith.constant 0 : i32
    %c0_i32_1 = arith.constant 0 : i32
    return %c0_i32, %c0_i32_0 : i32, i32
  }
  func.func @transform_8(%arg0: i32) -> (i32, i32) {
    %c0_i32 = arith.constant 0 : i32
    %c0_i32_0 = arith.constant 0 : i32
    %c0_i32_1 = arith.constant 0 : i32
    return %c0_i32, %c0_i32_0 : i32, i32
  }
  func.func @transform_9(%arg0: i32) -> (i32, i32, i32) {
    %c0_i32 = arith.constant 0 : i32
    %c0_i32_0 = arith.constant 0 : i32
    %c0_i32_1 = arith.constant 0 : i32
    return %arg0, %c0_i32, %c0_i32_0 : i32, i32, i32
  }
}

module attributes {stable_mosaic.version = 11 : i64} {
  func.func @_linear_kernel(%arg0: i32, %arg1: i32, %arg2: memref<16x256xbf16, #tpu.memory_space<vmem>>, %arg3: memref<256x256xbf16, #tpu.memory_space<vmem>>, %arg4: memref<1x256xf32, #tpu.memory_space<vmem>>, %arg5: memref<16x256xbf16, #tpu.memory_space<vmem>>, %arg6: memref<16x256xf32, #tpu.memory_space<vmem>>) attributes {dimension_semantics = [#tpu.dimension_semantics<parallel>, #tpu.dimension_semantics<arbitrary>], iteration_bounds = array<i64: 1, 1>, scalar_prefetch = 0 : i64, scratch_operands = 1 : i64, tpu.core_type = #tpu.core_type<tc>, window_params = [{transform_indices = @transform_0, window_bounds = array<i64: 16, 256>}, {transform_indices = @transform_1, window_bounds = array<i64: 256, 256>}, {transform_indices = @transform_2, window_bounds = array<i64: 1, 256>}, {transform_indices = @transform_3, window_bounds = array<i64: 16, 256>}]} {
    %c0_i32 = arith.constant 0 : i32
    %0 = arith.cmpi eq, %arg1, %c0_i32 : i32
    %1 = arith.extui %0 : i1 to i32
    %c0_i32_0 = arith.constant 0 : i32
    %2 = arith.cmpi ne, %1, %c0_i32_0 : i32
    scf.if %2 {
      %cst_10 = arith.constant 0.000000e+00 : f32
      %12 = vector.broadcast %cst_10 : f32 to vector<16x256xf32>
      %c0_11 = arith.constant 0 : index
      %c0_12 = arith.constant 0 : index
      %13 = vector.load %arg6[%c0_11, %c0_12] : memref<16x256xf32, #tpu.memory_space<vmem>>, vector<16x256xf32>
      tpu.vector_store %arg6[%c0_11, %c0_12], %12 {strides = array<i32>} : memref<16x256xf32, #tpu.memory_space<vmem>>, vector<16x256xf32>,
    } else {
    }
    %c0 = arith.constant 0 : index
    %c0_1 = arith.constant 0 : index
    %3 = vector.load %arg6[%c0, %c0_1] : memref<16x256xf32, #tpu.memory_space<vmem>>, vector<16x256xf32>
    %c0_2 = arith.constant 0 : index
    %c0_3 = arith.constant 0 : index
    %4 = vector.load %arg2[%c0_2, %c0_3] : memref<16x256xbf16, #tpu.memory_space<vmem>>, vector<16x256xbf16>
    %c0_4 = arith.constant 0 : index
    %c0_5 = arith.constant 0 : index
    %5 = vector.load %arg3[%c0_4, %c0_5] : memref<256x256xbf16, #tpu.memory_space<vmem>>, vector<256x256xbf16>
    %cst = arith.constant dense<0.000000e+00> : vector<16x256xf32>
    %6 = tpu.matmul %4, %5, %cst {dimension_numbers = #tpu.dot_dimension_numbers<[1], [0], [0], [1], [0, 0, 1, 1], [], []>} : vector<16x256xbf16>, vector<256x256xbf16>, vector<16x256xf32> -> vector<16x256xf32>
    %7 = arith.addf %3, %6 : vector<16x256xf32>
    %c0_6 = arith.constant 0 : index
    %c0_7 = arith.constant 0 : index
    %8 = vector.load %arg6[%c0_6, %c0_7] : memref<16x256xf32, #tpu.memory_space<vmem>>, vector<16x256xf32>
    tpu.vector_store %arg6[%c0_6, %c0_7], %7 {strides = array<i32>} : memref<16x256xf32, #tpu.memory_space<vmem>>, vector<16x256xf32>,
    %c0_i32_8 = arith.constant 0 : i32
    %9 = arith.cmpi eq, %arg1, %c0_i32_8 : i32
    %10 = arith.extui %9 : i1 to i32
    %c0_i32_9 = arith.constant 0 : i32
    %11 = arith.cmpi ne, %10, %c0_i32_9 : i32
    scf.if %11 {
      %c0_10 = arith.constant 0 : index
      %c0_11 = arith.constant 0 : index
      %12 = vector.load %arg6[%c0_10, %c0_11] : memref<16x256xf32, #tpu.memory_space<vmem>>, vector<16x256xf32>
      %c0_12 = arith.constant 0 : index
      %c0_13 = arith.constant 0 : index
      %13 = vector.load %arg4[%c0_12, %c0_13] : memref<1x256xf32, #tpu.memory_space<vmem>>, vector<1x256xf32>
      %14 = vector.broadcast %13 : vector<1x256xf32> to vector<16x256xf32>
      %15 = arith.addf %12, %14 : vector<16x256xf32>
      %cst_14 = arith.constant 0.000000e+00 : f32
      %16 = vector.broadcast %cst_14 : f32 to vector<16x256xf32>
      %17 = arith.maximumf %15, %16 : vector<16x256xf32>
      %18 = arith.truncf %17 : vector<16x256xf32> to vector<16x256xbf16>
      %c0_15 = arith.constant 0 : index
      %c0_16 = arith.constant 0 : index
      %19 = vector.load %arg5[%c0_15, %c0_16] : memref<16x256xbf16, #tpu.memory_space<vmem>>, vector<16x256xbf16>
      tpu.vector_store %arg5[%c0_15, %c0_16], %18 {strides = array<i32>} : memref<16x256xbf16, #tpu.memory_space<vmem>>, vector<16x256xbf16>,
    } else {
    }
    return
  }
  func.func @transform_0(%arg0: i32, %arg1: i32) -> (i32, i32) {
    %c0_i32 = arith.constant 0 : i32
    %c0_i32_0 = arith.constant 0 : i32
    return %c0_i32, %arg1 : i32, i32
  }
  func.func @transform_1(%arg0: i32, %arg1: i32) -> (i32, i32) {
    %c0_i32 = arith.constant 0 : i32
    return %arg1, %arg0 : i32, i32
  }
  func.func @transform_2(%arg0: i32, %arg1: i32) -> (i32, i32) {
    %c0_i32 = arith.constant 0 : i32
    %c0_i32_0 = arith.constant 0 : i32
    return %c0_i32, %arg0 : i32, i32
  }
  func.func @transform_3(%arg0: i32, %arg1: i32) -> (i32, i32) {
    %c0_i32 = arith.constant 0 : i32
    %c0_i32_0 = arith.constant 0 : i32
    return %c0_i32, %arg0 : i32, i32
  }
}

module attributes {stable_mosaic.version = 11 : i64} {
  func.func @_head_kernel(%arg0: memref<16x256xbf16, #tpu.memory_space<vmem>>, %arg1: memref<256x2xbf16, #tpu.memory_space<vmem>>, %arg2: memref<1x2xf32, #tpu.memory_space<vmem>>, %arg3: memref<16x2xf32, #tpu.memory_space<vmem>>) attributes {dimension_semantics = [], scalar_prefetch = 0 : i64, scratch_operands = 0 : i64, tpu.core_type = #tpu.core_type<tc>} {
    %c0 = arith.constant 0 : index
    %c0_0 = arith.constant 0 : index
    %0 = vector.load %arg0[%c0, %c0_0] : memref<16x256xbf16, #tpu.memory_space<vmem>>, vector<16x256xbf16>
    %c0_1 = arith.constant 0 : index
    %c0_2 = arith.constant 0 : index
    %1 = vector.load %arg1[%c0_1, %c0_2] : memref<256x2xbf16, #tpu.memory_space<vmem>>, vector<256x2xbf16>
    %cst = arith.constant dense<0.000000e+00> : vector<16x2xf32>
    %2 = tpu.matmul %0, %1, %cst {dimension_numbers = #tpu.dot_dimension_numbers<[1], [0], [0], [1], [0, 0, 1, 1], [], []>} : vector<16x256xbf16>, vector<256x2xbf16>, vector<16x2xf32> -> vector<16x2xf32>
    %c0_3 = arith.constant 0 : index
    %c0_4 = arith.constant 0 : index
    %3 = vector.load %arg2[%c0_3, %c0_4] : memref<1x2xf32, #tpu.memory_space<vmem>>, vector<1x2xf32>
    %4 = vector.broadcast %3 : vector<1x2xf32> to vector<16x2xf32>
    %5 = arith.addf %2, %4 : vector<16x2xf32>
    %cst_5 = arith.constant dense<0xFF800000> : vector<16xf32>
    %6 = vector.multi_reduction <maximumf>, %5, %cst_5 [1] : vector<16x2xf32> to vector<16xf32>
    %7 = vector.shape_cast %6 : vector<16xf32> to vector<16x1xf32>
    %8 = vector.broadcast %7 : vector<16x1xf32> to vector<16x2xf32>
    %9 = arith.subf %5, %8 : vector<16x2xf32>
    %10 = math.exp %9 : vector<16x2xf32>
    %cst_6 = arith.constant dense<0.000000e+00> : vector<16xf32>
    %11 = vector.multi_reduction <add>, %10, %cst_6 [1] : vector<16x2xf32> to vector<16xf32>
    %12 = vector.shape_cast %11 : vector<16xf32> to vector<16x1xf32>
    %13 = math.log %12 : vector<16x1xf32>
    %14 = vector.broadcast %13 : vector<16x1xf32> to vector<16x2xf32>
    %15 = arith.subf %9, %14 : vector<16x2xf32>
    %c0_7 = arith.constant 0 : index
    %c0_8 = arith.constant 0 : index
    %16 = vector.load %arg3[%c0_7, %c0_8] : memref<16x2xf32, #tpu.memory_space<vmem>>, vector<16x2xf32>
    tpu.vector_store %arg3[%c0_7, %c0_8], %15 {strides = array<i32>} : memref<16x2xf32, #tpu.memory_space<vmem>>, vector<16x2xf32>,
    return
  }
}

</mosaic_0001>

<bundles_post_ra>
// kernel: tpu_custom_call.1
= control target key start
LH: loop header
LB: loop body
LE: loop exit
PB: predicated region body
PF: predicated region fallthrough
CT: control target
= control target key end

     0   :  { %6 = vsyncpa [#allocation3], 0  ;;  %s341_s0 = inlined_call_operand.hbm [shape: f32[8,128], index: 0, kind: input, shape index: {}]   ;;  %s342_s1 = inlined_call_operand.hbm [shape: f32[8,128], index: 1, kind: output, shape index: {}]  }
   0x1   :  { %7 = vsyncpa [#allocation4], 0  ;;  %s262_s6 = smov 0  }
   0x2 LB: > { %s145_s7 = sadd.s32 4294967295, %s248_s6   ;;  %p146_p0 = scmp.ge.s32.totalorder %s248_s6, 1  ;;  %s248_s6 = sphi %s262_s6, %s13_s6  }
   0x3   : > { %p60_p1 = scmp.lt.s32.totalorder %s248_s6, 3  ;;  %p276_p3 = scmp.eq.s32.totalorder %s145_s7, 0 }
   0x4   : > { %s250_s10 = smov [#allocation2]   ;;  %s180_s15 = scalar_lea.hbm %s341_s0, 128 }
   0x5   : > { %p270_p2 = pnand %p146_p0, %p60_p1  ;;  %s73_s11 = sshll.u32 %s250_s10, 4  ;;  %s74_s11 = int_to_ptr.vmem [resolvable:$true] %s73_s11 }
   0x6   : > { %s347_s9 = scalar_select %p276_p3, 1, 0 }
   0x7   : > { %s346_s8 = scalar_select %p270_p2, 1, 0 }
   0x8   : > { %p162_p4 = pneg %p270_p2  ;;  %p181_p6 = scmp.ne.s32.totalorder %s341_s0, %s180_s15 }
   0x9   : > { %p187_p10 = scmp.lt.u32.totalorder %s180_s15, %s341_s0 }
   0xa   : > { %p284_p5 = pnand %p276_p3, %p162_p4 }
   0xc   : > { %p182_p7 = pneg %p284_p5 }
   0xe   : > { %p183_p8 = pnand %p182_p7, %p181_p6 }
  0x10   : > { %p184_p9 = pneg %p183_p8 }
  0x12   : > { %p189_p11 = pnand %p187_p10, %p184_p9 }
  0x14   : > { %192 = shalt.err (!%p189_p11)
}
  0x15   : > { %s193_s20 = scalar_lea.vmem %s74_s11, 128  ;;  %p201_p1 = scmp.lt.s32.totalorder %s74_s11, %s74_s11 }
  0x16   : > { %p194_p12 = scmp.ne.s32.totalorder %s74_s11, %s193_s20  ;;  %p202_p4 = scmp.lt.s32.totalorder %s193_s20, %s193_s20 }
  0x18   : > { %p196_p13 = pnand %p194_p12, %p182_p7  ;;  %p203_p3 = por %p202_p4, %p201_p1 }
  0x1a   : > { %p197_p0 = pneg %p196_p13 }
  0x1c   : > { %p204_p2 = pnand %p203_p3, %p197_p0 }
  0x1e   : > { %207 = shalt.err (!%p204_p2)
}
  0x1f   : > { %165 = dma.hbm_to_vmem [thread:$0]  (!%p284_p5), %s341_s0, 128, %s74_s11, [#allocation3]  }
  0x20   : > { %p349_p6 = scmp.ne.s32.totalorder %s346_s8, 0 }
  0x21   : > { %p350_p8 = scmp.ne.s32.totalorder (!%p349_p6), %s347_s9, 0 }
  0x22   : > { %86 = sbr.rel (%p349_p6) target bundleno = 67 (0x43), region = 24 }
  0x29   : > { %239 = dma.done.wait (%p350_p8), [#allocation3], 128  }
  0x2a   : > { %241 = vsyncadd (%p350_p8), [#allocation3], 4294967168  ;;  %s251_s23 = smov [#allocation5]   ;;  %v96_v0 = vld [vmem:[#allocation2] sm:$0xff]  ;;  %p312_p2 = scmp.eq.s32.totalorder %s145_s7, 1 }
  0x2b   : > { %s106_s24 = sshll.u32 %s251_s23, 4  ;;  %v97_v1 = vadd.f32 1.0, %v96_v0  ;;  %s107_s24 = int_to_ptr.vmem [resolvable:$true] %s106_s24 }
  0x2c   : > { %s208_s26 = scalar_lea.vmem %s107_s24, 128  ;;  %p215_p9 = scmp.lt.s32.totalorder %s107_s24, %s107_s24 }
  0x2d   : > { %98 = vst [vmem:[#allocation5] sm:$0xff] %v97_v1  ;;  %p209_p3 = scmp.ne.s32.totalorder %s107_s24, %s208_s26  ;;  %p216_p10 = scmp.lt.s32.totalorder %s208_s26, %s208_s26 }
  0x2f   : > { %p210_p5 = pnand %p209_p3, %p312_p2  ;;  %p217_p11 = por %p216_p10, %p215_p9 }
  0x31   : > { %p211_p7 = pneg %p210_p5 }
  0x33   : > { %p218_p12 = pnand %p217_p11, %p211_p7 }
  0x35   : > { %221 = shalt.err (!%p218_p12)
}
  0x36   : > { %s222_s29 = scalar_lea.hbm %s342_s1, 128 }
  0x37   : > { %p223_p13 = scmp.ne.s32.totalorder %s342_s1, %s222_s29  ;;  %p228_p4 = scmp.lt.u32.totalorder %s222_s29, %s342_s1 }
  0x39   : > { %p224_p0 = pnand %p223_p13, %p312_p2 }
  0x3b   : > { %p225_p1 = pneg %p224_p0 }
  0x3d   : > { %p230_p6 = pnand %p228_p4, %p225_p1 }
  0x3f   : > { %233 = shalt.err (!%p230_p6)
}
  0x40   : > { %159 = dma.vmem_to_hbm [thread:$0]  (%p312_p2), %s107_s24, 128, %s342_s1, [#allocation4]  }
  0x41   : > { %243 = dma.done.wait (%p312_p2), [#allocation4], 128  }
  0x42   : > { %245 = vsyncadd (%p312_p2), [#allocation4], 4294967168 }
  0x43 PF: > { %s13_s6 = sadd.s32 1, %s248_s6  }
  0x44   : > { %p10_p8 = scmp.ge.s32.totalorder %s13_s6, 4  }
  0x46   :  { %12 = sbr.rel (!%p10_p8) target bundleno = 2 (0x2), region = 53 }
  0x4d   :  { %119 = vsyncpa [#allocation3], 1 }
  0x4e   :  { %121 = vsyncpa [#allocation3 + $0x1], 1 }
  0x4f   :  { %122 = vsyncpa [#allocation4], 1 }
  0x50   :  { %124 = vsyncpa [#allocation4 + $0x1], 1 }

// kernel: char_cnn_forward.5
= control target key start
LH: loop header
LB: loop body
LE: loop exit
PB: predicated region body
PF: predicated region fallthrough
CT: control target
= control target key end

     0   :  { %v290_v34 = vlaneseq  ;;  %s546_s1 = inlined_call_operand.vmem [shape: bf16[256,256], index: 1, kind: input, shape index: {}]   ;;  %s547_s0 = inlined_call_operand.vmem [shape: bf16[16,256], index: 0, kind: input, shape index: {}]   ;;  %s548_s2 = inlined_call_operand.vmem [shape: f32[1,256], index: 2, kind: input, shape index: {}]   ;;  %s549_s3 = inlined_call_operand.vmem [shape: bf16[16,256], index: 3, kind: output, shape index: {}]  }
   0x1   :  { %v364_v0 = vld [vmem:[%s546_s1 + $0x4] ss:$8 sps:$4 sm:$0xff]   ;;  %v366_v1 = vld [vmem:[%s546_s1] ss:$8 sps:$4 sm:$0xff]   ;;  %v367_v2 = vld [vmem:[%s546_s1 + $0x14] ss:$8 sps:$4 sm:$0xff]  }
   0x2   :  { %230 = vmatprep.subr.bf16.mxu0 %v364_v0  ;;  %v369_v3 = vld [vmem:[%s546_s1 + $0x10] ss:$8 sps:$4 sm:$0xff]   ;;  %v370_v4 = vld [vmem:[%s546_s1 + $0x24] ss:$8 sps:$4 sm:$0xff]   ;;  %v372_v5 = vld [vmem:[%s546_s1 + $0x20] ss:$8 sps:$4 sm:$0xff]  }
   0x3   :  { %231 = vmatpush1.bf16.msra.mxu0 %v366_v1  ;;  %v373_v6 = vld [vmem:[%s546_s1 + $0x34] ss:$8 sps:$4 sm:$0xff]   ;;  %v375_v7 = vld [vmem:[%s546_s1 + $0x30] ss:$8 sps:$4 sm:$0xff]   ;;  %v376_v8 = vld [vmem:[%s546_s1 + $0x44] ss:$8 sps:$4 sm:$0xff]  }
   0x4   :  { %232 = vmatprep.subr.bf16.mxu0 %v367_v2  ;;  %v378_v9 = vld [vmem:[%s546_s1 + $0x40] ss:$8 sps:$4 sm:$0xff]   ;;  %v379_v10 = vld [vmem:[%s546_s1 + $0x54] ss:$8 sps:$4 sm:$0xff]   ;;  %v381_v11 = vld [vmem:[%s546_s1 + $0x50] ss:$8 sps:$4 sm:$0xff]  }
   0x5   :  { %v382_v12 = vld [vmem:[%s546_s1 + $0x64] ss:$8 sps:$4 sm:$0xff]   ;;  %v384_v14 = vld [vmem:[%s546_s1 + $0x60] ss:$8 sps:$4 sm:$0xff]   ;;  %v385_v15 = vld [vmem:[%s546_s1 + $0x74] ss:$8 sps:$4 sm:$0xff]  }
   0x6   :  { %v414_v13 = vld [vmem:[%s547_s0 + $0x4] ss:$8 sps:$4 sm:$0xff]   ;;  %v387_v16 = vld [vmem:[%s546_s1 + $0x70] ss:$8 sps:$4 sm:$0xff]   ;;  %v390_v18 = vld [vmem:[%s546_s1 + $0x80] ss:$8 sps:$4 sm:$0xff]  }
   0x7   :  { %233 = vmatpush1.bf16.msra.mxu0 %v369_v3  ;;  %262 = vmatprep.mubr.bf16.mxu0 %v414_v13  ;;  %v388_v17 = vld [vmem:[%s546_s1 + $0x84] ss:$8 sps:$4 sm:$0xff]   ;;  %v391_v19 = vld [vmem:[%s546_s1 + $0x94] ss:$8 sps:$4 sm:$0xff]   ;;  %v393_v20 = vld [vmem:[%s546_s1 + $0x90] ss:$8 sps:$4 sm:$0xff]  }
   0x8   :  { %234 = vmatprep.subr.bf16.mxu0 %v370_v4  ;;  %v394_v21 = vld [vmem:[%s546_s1 + $0xa4] ss:$8 sps:$4 sm:$0xff]   ;;  %v396_v22 = vld [vmem:[%s546_s1 + $0xa0] ss:$8 sps:$4 sm:$0xff]   ;;  %v397_v23 = vld [vmem:[%s546_s1 + $0xb4] ss:$8 sps:$4 sm:$0xff]  }
   0x9   :  { %v399_v24 = vld [vmem:[%s546_s1 + $0xb0] ss:$8 sps:$4 sm:$0xff]   ;;  %v400_v25 = vld [vmem:[%s546_s1 + $0xc4] ss:$8 sps:$4 sm:$0xff]   ;;  %v402_v26 = vld [vmem:[%s546_s1 + $0xc0] ss:$8 sps:$4 sm:$0xff]  }
   0xa   :  { %v403_v27 = vld [vmem:[%s546_s1 + $0xd4] ss:$8 sps:$4 sm:$0xff]   ;;  %v405_v28 = vld [vmem:[%s546_s1 + $0xd0] ss:$8 sps:$4 sm:$0xff]   ;;  %v406_v29 = vld [vmem:[%s546_s1 + $0xe4] ss:$8 sps:$4 sm:$0xff]  }
   0xb   :  { %235 = vmatpush1.bf16.msra.mxu0 %v372_v5  ;;  %v408_v30 = vld [vmem:[%s546_s1 + $0xe0] ss:$8 sps:$4 sm:$0xff]   ;;  %v409_v31 = vld [vmem:[%s546_s1 + $0xf4] ss:$8 sps:$4 sm:$0xff]   ;;  %v411_v32 = vld [vmem:[%s546_s1 + $0xf0] ss:$8 sps:$4 sm:$0xff]  }
   0xc   :  { %236 = vmatprep.subr.bf16.mxu0 %v373_v6  ;;  %v412_v33 = vld [vmem:[%s547_s0] ss:$8 sps:$4 sm:$0xff]   ;;  %v291_v35 = vshrl.u32 %v290_v34, 7 }
   0xd   :  { %v288_v37 = vld [vmem:[%s548_s2] sm:$0x3] }
   0xe   :  { %v292_v36 = vsub.s32 0, %v291_v35  ;;  %v296_v38 = vsub.s32 1, %v291_v35 }
   0xf   :  { %237 = vmatpush1.bf16.msra.mxu0 %v375_v7 }
  0x10   :  { %238 = vmatprep.subr.bf16.mxu0 %v376_v8  ;;  %v293_v39 = vrot.slane %v288_v37, %v292_v36  ;;  %v297_v40 = vrot.slane %v288_v37, %v296_v38 }
  0x13   :  { %239 = vmatpush1.bf16.msra.mxu0 %v378_v9 }
  0x14   :  { %240 = vmatprep.subr.bf16.mxu0 %v379_v10 }
  0x17   :  { %241 = vmatpush1.bf16.msra.mxu0 %v381_v11 }
  0x18   :  { %242 = vmatprep.subr.bf16.mxu0 %v382_v12 }
  0x1b   :  { %243 = vmatpush1.bf16.msra.mxu0 %v384_v14 }
  0x1c   :  { %244 = vmatprep.subr.bf16.mxu0 %v385_v15 }
  0x1f   :  { %245 = vmatpush1.bf16.msra.mxu0 %v387_v16 }
  0x20   :  { %246 = vmatprep.subr.bf16.mxu0 %v388_v17 }
  0x23   :  { %247 = vmatpush1.bf16.msra.mxu0 %v390_v18 }
  0x24   :  { %248 = vmatprep.subr.bf16.mxu0 %v391_v19 }
  0x27   :  { %249 = vmatpush1.bf16.msra.mxu0 %v393_v20 }
  0x28   :  { %250 = vmatprep.subr.bf16.mxu0 %v394_v21 }
  0x2b   :  { %251 = vmatpush1.bf16.msra.mxu0 %v396_v22 }
  0x2c   :  { %252 = vmatprep.subr.bf16.mxu0 %v397_v23 }
  0x2f   :  { %253 = vmatpush1.bf16.msra.mxu0 %v399_v24 }
  0x30   :  { %254 = vmatprep.subr.bf16.mxu0 %v400_v25 }
  0x33   :  { %255 = vmatpush1.bf16.msra.mxu0 %v402_v26 }
  0x34   :  { %256 = vmatprep.subr.bf16.mxu0 %v403_v27 }
  0x37   :  { %257 = vmatpush1.bf16.msra.mxu0 %v405_v28 }
  0x38   :  { %258 = vmatprep.subr.bf16.mxu0 %v406_v29 }
  0x3b   :  { %259 = vmatpush1.bf16.msra.mxu0 %v408_v30 }
  0x3c   :  { %260 = vmatprep.subr.bf16.mxu0 %v409_v31 }
  0x3f   :  { %261 = vmatpush1.bf16.msra.mxu0 %v411_v32 }
  0x42   :  { %263 = vmatmul.mubr.bf16.vlgmr.msra.gmra.mrb[0].mxu0 %v412_v33 }
 0x115   :  { %v264_v41 = vpop.f32.mrb[0].mxu0 }
 0x116   :  { %v300_v42 = vadd.f32 %v293_v39, %v264_v41  ;;  %v266_v43 = vpop.f32.mrb[1].mxu0 }
 0x117   :  { %v301_v44 = vadd.f32 %v297_v40, %v266_v43  ;;  %v268_v45 = vpop.f32.mrb[2].mxu0 }
 0x118   :  { %v304_v46 = vmax.f32 %v300_v42, 0.0  ;;  %v302_v47 = vadd.f32 %v293_v39, %v268_v45  ;;  %v270_v48 = vpop.f32.mrb[3].mxu0 }
 0x119   :  { %v305_v49 = vmax.f32 %v301_v44, 0.0  ;;  %v303_v50 = vadd.f32 %v297_v40, %v270_v48 }
 0x11a   :  { %v306_v51 = vmax.f32 %v302_v47, 0.0 }
 0x11b   :  { %v362_v52 = vpack.c.bf16 %v305_v49, %v304_v46  ;;  %v307_v53 = vmax.f32 %v303_v50, 0.0 }
 0x11d   :  { %320 = vst [vmem:[%s549_s3] sm:$0xff] %v362_v52  ;;  %v363_v54 = vpack.c.bf16 %v307_v53, %v306_v51 }
 0x11f   :  { %321 = vst [vmem:[%s549_s3 + $0x8] sm:$0xff] %v363_v54 }

// kernel: char_cnn_forward.4
= control target key start
LH: loop header
LB: loop body
LE: loop exit
PB: predicated region body
PF: predicated region fallthrough
CT: control target
= control target key end

     0   :  { %s2356_s30 = smov 0   ;;  %s2688_s0 = inlined_call_operand.vmem [shape: bf16[16,60,80], index: 0, kind: input, shape index: {}]   ;;  %s2689_s1 = inlined_call_operand.vmem [shape: bf16[80,128], index: 1, kind: input, shape index: {}]   ;;  %s2690_s2 = inlined_call_operand.vmem [shape: bf16[3,128,128], index: 2, kind: input, shape index: {}]   ;;  %s2691_s3 = inlined_call_operand.vmem [shape: bf16[3,128,128], index: 3, kind: input, shape index: {}]   ;;  %s2692_s4 = inlined_call_operand.vmem [shape: bf16[3,128,128], index: 4, kind: input, shape index: {}]   ;;  %s2693_s5 = inlined_call_operand.vmem [shape: f32[1,128], index: 5, kind: input, shape index: {}]   ;;  %s2694_s6 = inlined_call_operand.vmem [shape: f32[1,128], index: 6, kind: input, shape index: {}]   ;;  %s2695_s7 = inlined_call_operand.vmem [shape: f32[1,128], index: 7, kind: input, shape index: {}]   ;;  %s2696_s8 = inlined_call_operand.vmem [shape: f32[1,128], index: 8, kind: input, shape index: {}]   ;;  %s2697_s9 = inlined_call_operand.vmem [shape: bf16[16,2,128], index: 9, kind: output, shape index: {}]  }
   0x1 LB: > { %s1694_s10 = sadd.s32 4294967295, %s2302_s30   ;;  %p1698_p0 = scmp.ge.s32.totalorder %s2302_s30, 1  ;;  %s2302_s30 = sphi %s2356_s30, %s19_s30  }
   0x2   : > { %p287_p1 = scmp.lt.s32.totalorder %s2302_s30, 17 }
   0x4   : > { %p288_p2 = pnand %p1698_p0, %p287_p1 }
   0x5   : > { %v2209_v0 = vld [vmem:[%s2689_s1] sm:$0xff] (!%p288_p2)   ;;  %p321_p3 = scmp.lt.s32.totalorder (!%p288_p2), %s1694_s10, 15  ;;  %v2210_v1 = vld [vmem:[%s2689_s1 + $0x8] sm:$0xff] (!%p288_p2)   ;;  %vm405_vm0 = vcmask (!%p288_p2), 654336   ;;  %v2211_v2 = vld [vmem:[%s2689_s1 + $0x10] sm:$0xff] (!%p288_p2)   ;;  %vm819_vm2 = vcmask (!%p288_p2), 1046528  }
   0x6   : > { %291 = sbr.rel (%p288_p2) target bundleno = 1087 (0x43f), region = 56  ;;  %2001 = vmatprep.subr.bf16.mxu0 (!%p288_p2), %v2209_v0  ;;  %v2212_v4 = vld [vmem:[%s2689_s1 + $0x18] sm:$0xff] (!%p288_p2)   ;;  %v2213_v5 = vld [vmem:[%s2689_s1 + $0x20] sm:$0xff] (!%p288_p2)   ;;  %v2219_v10 = vld [vmem:[%s2690_s2 + $0x8] sm:$0xff] (!%p288_p2)   ;;  %vm583_vm1 = vsmask.f32 (!%p288_p2), 7424 }
   0x7   : > { %2002 = vmatpush3.bf16.msra.mxu0 (!%p288_p2), %v2209_v0  ;;  %v2218_v9 = vld [vmem:[%s2690_s2] sm:$0xff] (!%p288_p2)   ;;  %v2221_v12 = vld [vmem:[%s2690_s2 + $0x10] sm:$0xff] (!%p288_p2)   ;;  %v2222_v13 = vld [vmem:[%s2690_s2 + $0x48] sm:$0xff] (!%p288_p2)   ;;  %vm2305_vm3 = vmmov (!%p288_p2), 0  }
   0x8   : > { %2003 = vmatprep.subr.bf16.mxu0 (!%p288_p2), %v2210_v1  ;;  %v2220_v11 = vld [vmem:[%s2690_s2 + $0x40] sm:$0xff] (!%p288_p2)   ;;  %v2223_v14 = vld [vmem:[%s2690_s2 + $0x18] sm:$0xff] (!%p288_p2)   ;;  %v2224_v15 = vld [vmem:[%s2690_s2 + $0x50] sm:$0xff] (!%p288_p2)  }
   0x9   : > { %2019 = vmatprep.subr.bf16.mxu1 (!%p288_p2), %v2220_v11  ;;  %v2225_v16 = vld [vmem:[%s2690_s2 + $0x20] sm:$0xff] (!%p288_p2)   ;;  %v2226_v17 = vld [vmem:[%s2690_s2 + $0x58] sm:$0xff] (!%p288_p2)   ;;  %v2227_v18 = vld [vmem:[%s2690_s2 + $0x28] sm:$0xff] (!%p288_p2)  }
   0xa   : > { %2020 = vmatpush3.bf16.msra.mxu1 (!%p288_p2), %v2220_v11  ;;  %v2228_v19 = vld [vmem:[%s2690_s2 + $0x60] sm:$0xff] (!%p288_p2)   ;;  %v2229_v20 = vld [vmem:[%s2690_s2 + $0x30] sm:$0xff] (!%p288_p2)   ;;  %v2230_v21 = vld [vmem:[%s2690_s2 + $0x68] sm:$0xff] (!%p288_p2)  }
   0xb   : > { %2004 = vmatpush3.bf16.msra.mxu0 (!%p288_p2), %v2210_v1  ;;  %2021 = vmatprep.subr.bf16.mxu1 (!%p288_p2), %v2222_v13  ;;  %v2231_v22 = vld [vmem:[%s2690_s2 + $0x38] sm:$0xff] (!%p288_p2)   ;;  %v2232_v23 = vld [vmem:[%s2690_s2 + $0x70] sm:$0xff] (!%p288_p2)   ;;  %v2440_v25 = vld [vmem:[%s2690_s2 + $0x80] sm:$0xff] (!%p288_p2)  }
   0xc   : > { %2005 = vmatprep.subr.bf16.mxu0 (!%p288_p2), %v2211_v2  ;;  %v2236_v24 = vld [vmem:[%s2690_s2 + $0x78] sm:$0xff] (!%p288_p2)   ;;  %v1701_v26 = vld [vmem:[%s2693_s5] ss:$0 sm:$0xff] (!%p288_p2) }
   0xd   : > { %s2699_s10 = smov (!%p321_p3, %s1694_s10), 15 }
   0xe   : > { %s1899_s17 = sshll.u32 %s2699_s10, 5  ;;  %2022 = vmatpush3.bf16.msra.mxu1 %v2222_v13  ;;  %s328_s27 = scalar_lea.vmem %s2697_s9, %s2699_s10 }
   0xf   : > { %s325_s20 = scalar_lea.vmem %s2688_s0, %s1899_s17  ;;  %2006 = vmatpush3.bf16.msra.mxu0 %v2211_v2  ;;  %2023 = vmatprep.subr.bf16.mxu1 %v2224_v15 }
  0x10   : > { %v2214_v3 = vld [vmem:[%s325_s20] sm:$0xff]   ;;  %2007 = vmatprep.subr.bf16.mxu0 %v2212_v4  ;;  %v2215_v6 = vld [vmem:[%s325_s20 + $0x8] sm:$0xff]   ;;  %v2216_v7 = vld [vmem:[%s325_s20 + $0x10] sm:$0xff]  }
  0x11   : > { %2011 = vmatprep.mubr.msk.bf16.mxu0 %vm405_vm0, %v2214_v3  ;;  %v2217_v8 = vld [vmem:[%s325_s20 + $0x18] sm:$0x3f]  }
  0x12   : > { %2024 = vmatpush3.bf16.msra.mxu1 %v2224_v15 }
  0x13   : > { %2008 = vmatpush3.bf16.msra.mxu0 %v2212_v4  ;;  %2025 = vmatprep.subr.bf16.mxu1 %v2226_v17 }
  0x14   : > { %2009 = vmatprep.subr.bf16.mxu0 %v2213_v5 }
  0x16   : > { %2026 = vmatpush3.bf16.msra.mxu1 %v2226_v17 }
  0x17   : > { %2010 = vmatpush3.bf16.msra.mxu0 %v2213_v5  ;;  %2027 = vmatprep.subr.bf16.mxu1 %v2228_v19 }
  0x18   : > { %2039 = vmatprep.subr.bf16.mxu0 %v2218_v9 }
  0x1a   : > { %2012 = vmatmul.mubr.msk.bf16.vlgmr.msra.gmra.mrb[0].mxu0 %vm405_vm0, %v2215_v6  ;;  %2028 = vmatpush3.bf16.msra.mxu1 %v2228_v19 }
  0x1b   : > { %2015 = vmatprep.mubr.msk.bf16.mxu0 %vm405_vm0, %v2216_v7  ;;  %2040 = vmatpush3.bf16.msra.mxu0 %v2218_v9 }
  0x1c   : > { %2041 = vmatprep.subr.bf16.mxu0 %v2219_v10  ;;  %2029 = vmatprep.subr.bf16.mxu1 %v2230_v21 }
  0x1e   : > { %2030 = vmatpush3.bf16.msra.mxu1 %v2230_v21 }
  0x1f   : > { %2042 = vmatpush3.bf16.msra.mxu0 %v2219_v10  ;;  %2031 = vmatprep.subr.bf16.mxu1 %v2232_v23 }
  0x20   : > { %2043 = vmatprep.subr.bf16.mxu0 %v2221_v12 }
  0x22   : > { %2016 = vmatmul.mubr.msk.bf16.gmra.mrb[4].mxu0 %vm405_vm0, %v2217_v8  ;;  %2032 = vmatpush3.bf16.msra.mxu1 %v2232_v23 }
  0x23   : > { %2044 = vmatpush3.bf16.msra.mxu0 %v2221_v12  ;;  %2033 = vmatprep.subr.bf16.mxu1 %v2236_v24 }
  0x24   : > { %2045 = vmatprep.subr.bf16.mxu0 %v2223_v14 }
  0x26   : > { %2034 = vmatpush3.bf16.msra.mxu1 %v2236_v24  ;;  %v2240_v24 = vld [vmem:[%s2690_s2 + $0x90] sm:$0xff]  }
  0x27   : > { %2046 = vmatpush3.bf16.msra.mxu0 %v2223_v14  ;;  %2059 = vmatprep.subr.bf16.mxu1 %v2440_v25 }
  0x28   : > { %2047 = vmatprep.subr.bf16.mxu0 %v2225_v16 }
  0x2b   : > { %2048 = vmatpush3.bf16.msra.mxu0 %v2225_v16 }
  0x2c   : > { %2049 = vmatprep.subr.bf16.mxu0 %v2227_v18 }
  0x2f   : > { %2050 = vmatpush3.bf16.msra.mxu0 %v2227_v18 }
  0x30   : > { %2051 = vmatprep.subr.bf16.mxu0 %v2229_v20 }
  0x33   : > { %2052 = vmatpush3.bf16.msra.mxu0 %v2229_v20 }
  0x34   : > { %2053 = vmatprep.subr.bf16.mxu0 %v2231_v22 }
  0x37   : > { %2054 = vmatpush3.bf16.msra.mxu0 %v2231_v22  ;;  %v2239_v22 = vld [vmem:[%s2690_s2 + $0x88] sm:$0xff]  }
  0xed   : > { %v2013_v27 = vpop.f32.mrb[0].mxu0 }
  0xee   : > { %v461_v28 = vadd.f32 %v2013_v27, %v1701_v26  ;;  %v452_v29 = vpop.f32.mrb[1].mxu0  ;;  %v2242_v27 = vld [vmem:[%s2690_s2 + $0xa0] sm:$0xff]  }
  0xef   : > { %v453_v30 = vadd.f32 %v1701_v26, %v452_v29  ;;  %v2014_v31 = vpop.f32.mrb[2].mxu0  ;;  %v2245_v29 = vld [vmem:[%s2690_s2 + $0xb8] sm:$0xff]  }
  0xf0   : > { %v485_v32 = vmax.f32 %v461_v28, 0.0  ;;  %v464_v33 = vadd.f32 %v2014_v31, %v1701_v26  ;;  %v455_v34 = vpop.f32.mrb[3].mxu0  ;;  %v2244_v28 = vld [vmem:[%s2690_s2 + $0xb0] sm:$0xff]   ;;  %v2304_v31 = vmov 0.0  }
  0xf1   : > { %v483_v35 = vmax.f32 %v453_v30, 0.0  ;;  %v456_v36 = vadd.f32 %v1701_v26, %v455_v34  ;;  %v2246_v30 = vld [vmem:[%s2691_s3] sm:$0xff]   ;;  %2079 = vmatprep.subr.bf16.mxu0 %v2304_v31  ;;  %v2249_v34 = vld [vmem:[%s2691_s3 + $0x10] sm:$0xff]  }
  0xf2   : > { %493 = vst [vmem:[#allocation2 + $0x10] sm:$0xff] %v485_v32  ;;  %v486_v37 = vmax.f32 %v464_v33, 0.0  ;;  %v2247_v32 = vld [vmem:[%s2691_s3 + $0x8] sm:$0xff]   ;;  %v2248_v33 = vld [vmem:[%s2691_s3 + $0x40] sm:$0xff]  }
  0xf3   : > { %491 = vst [vmem:[#allocation2] sm:$0xff] %v483_v35  ;;  %v484_v38 = vmax.f32 %v456_v36, 0.0  ;;  %v2250_v35 = vld [vmem:[%s2691_s3 + $0x48] sm:$0xff]   ;;  %v2251_v36 = vld [vmem:[%s2691_s3 + $0x18] sm:$0xff]  }
  0xf4   : > { %494 = vst [vmem:[#allocation2 + $0x18] sm:$0xff] %v486_v37  ;;  %v2252_v37 = vld [vmem:[%s2691_s3 + $0x50] sm:$0xff]  }
  0xf5   : > { %492 = vst [vmem:[#allocation2 + $0x8] sm:$0xff] %v484_v38  ;;  %v2017_v39 = vpop.f32.mrb[4].mxu0  ;;  %v2253_v38 = vld [vmem:[%s2691_s3 + $0x20] sm:$0xff]  }
  0xf6   : > { %v477_v40 = vadd.f32 %v2017_v39, %v1701_v26  ;;  %v468_v41 = vpop.f32.mrb[5].mxu0  ;;  %v2254_v39 = vld [vmem:[%s2691_s3 + $0x58] sm:$0xff]  }
  0xf7   : > { %v469_v42 = vadd.f32 %v1701_v26, %v468_v41  ;;  %v2018_v43 = vpop.f32.mrb[6].mxu0  ;;  %v2256_v41 = vld [vmem:[%s2691_s3 + $0x60] sm:$0xff]  }
  0xf8   : > { %v489_v44 = vmax.f32 %v477_v40, 0.0  ;;  %v480_v45 = vadd.f32 %v2018_v43, %v1701_v26  ;;  %v471_v46 = vpop.f32.mrb[7].mxu0  ;;  %v2255_v40 = vld [vmem:[%s2691_s3 + $0x28] sm:$0xff]  }
  0xf9   : > { %v487_v47 = vmax.f32 %v469_v42, 0.0  ;;  %v472_v48 = vadd.f32 %v1701_v26, %v471_v46  ;;  %v2241_v26 = vld [vmem:[%s2690_s2 + $0x98] sm:$0xff]   ;;  %v2257_v42 = vld [vmem:[%s2691_s3 + $0x30] sm:$0xff]   ;;  %v2258_v43 = vld [vmem:[%s2691_s3 + $0x68] sm:$0xff]  }
  0xfa   : > { %497 = vst [vmem:[#allocation2 + $0x30] sm:$0xff] %v489_v44  ;;  %v490_v49 = vmax.f32 %v480_v45, 0.0  ;;  %v2259_v44 = vld [vmem:[%s2691_s3 + $0x38] sm:$0xff]   ;;  %v2260_v45 = vld [vmem:[%s2691_s3 + $0x70] sm:$0xff]  }
  0xfb   : > { %495 = vst [vmem:[#allocation2 + $0x20] sm:$0xff] %v487_v47  ;;  %v488_v50 = vmax.f32 %v472_v48, 0.0  ;;  %v2261_v46 = vld [vmem:[%s2691_s3 + $0x78] sm:$0xff]  }
  0xfc   : > { %498 = vst [vmem:[#allocation2 + $0x38] sm:$0xf] %v490_v49  ;;  %v499_v51 = vld [vmem:[#allocation2] ss:$3 sm:$0xff]  ;;  %v505_v52 = vld [vmem:[#allocation2 + $0x1] ss:$3 sm:$0xff] }
  0xfd   : > { %496 = vst [vmem:[#allocation2 + $0x28] sm:$0xff] %v488_v50  ;;  %v516_v55 = vmax.f32 %v499_v51, %v505_v52  ;;  %v511_v62 = vld [vmem:[#allocation2 + $0x2] ss:$3 sm:$0xff] }
  0xff   : > { %v519_v0 = vmax.f32 %v516_v55, %v511_v62 }
 0x103   : > { %v503_v53 = vld [vmem:[#allocation2 + $0x30] ss:$3 sm:$0xf]  ;;  %v509_v54 = vld [vmem:[#allocation2 + $0x31] ss:$3 sm:$0xf] }
 0x104   : > { %v518_v56 = vmax.f32 %v503_v53, %v509_v54  ;;  %v501_v57 = vld [vmem:[#allocation2 + $0x18] ss:$3 sm:$0xff]  ;;  %v507_v59 = vld [vmem:[#allocation2 + $0x19] ss:$3 sm:$0xff]  ;;  %v513_v63 = vld [vmem:[#allocation2 + $0x1a] ss:$3 sm:$0xff] }
 0x105   : > { %v515_v58 = vld [vmem:[#allocation2 + $0x32] ss:$3 sm:$0xf]  ;;  %v517_v61 = vmax.f32 %v501_v57, %v507_v59  ;;  %v1778_v59 = vld [vmem:[%s2694_s6] ss:$0 sm:$0xff] }
 0x106   : > { %v521_v60 = vmax.f32 %v518_v56, %v515_v58 }
 0x107   : > { %v520_v2 = vmax.f32 %v517_v61, %v513_v63 }
 0x108   : > { %v1902_v1 = vpack.c.bf16 %v521_v60, %v521_v60 }
 0x109   : > { %v1906_v3 = vpack.c.bf16 %v520_v2, %v519_v0 }
 0x10a   : > { %537 = vst [vmem:[#allocation3 + $0x8] sm:$0x3] %v1902_v1 }
 0x10b   : > { %1907 = vst [vmem:[#allocation3] sm:$0xff] %v1906_v3  }
 0x111   : > { %v2237_v4 = vld [vmem:[#allocation3 + $0x8] ss:$0 sps:$4 sm:$0x33]  }
 0x112   : > { %v538_v5 = vld [vmem:[#allocation3] sm:$0xf]  ;;  %v539_v6 = vld [vmem:[#allocation3 + $0x4] sm:$0xf]  ;;  %v592_v9 = vshll.u32 %v2237_v4, 16  ;;  %v596_v17 = vshrl.u32 %v2237_v4, 16 }
 0x113   : > { %v798_v7 = vld [vmem:[#allocation3] sm:$0xe]  ;;  %v1734_v8 = vcombine.low %v538_v5, %v539_v6  ;;  %v2235_v10 = vld [vmem:[#allocation3 + $0x8] ss:$0 sps:$4 sm:$0x11]   ;;  %v821_v21 = vrot.slane %v2237_v4, 1 }
 0x114   : > { %v1769_v11 = vcombine.low %v798_v7, %v539_v6  ;;  %v594_v15 = vrot.slane %v592_v9, 1 }
 0x115   : > { %2055 = vmatprep.mubr.bf16.mxu0 %v1734_v8  ;;  %v587_v12 = vshll.u32 %v1734_v8, 16  ;;  %v585_v13 = vshrl.u32 %v1734_v8, 16 }
 0x116   : > { %2056 = vmatmul.mubr.bf16.vlgmr.msra.gmra.mrb[8].mxu0 %v2235_v10  ;;  %v820_v18 = vrot.slane %v1769_v11, 1  ;;  %v598_v20 = vor.u32 %v596_v17, %v594_v15 }
 0x117   : > { %v589_v14 = vrot.slane %v587_v12, 1  ;;  %2080 = vmatpush3.bf16.msra.mxu0 %v2248_v33  ;;  %2095 = vmatprep.mubr.msk.bf16.mxu0 %vm2305_vm3, %v2304_v31  ;;  %v2273_v33 = vld [vmem:[%s2692_s4 + $0x8] sm:$0xff]  }
 0x118   : > { %v822_v23 = vsel %vm819_vm2, %v820_v18, %v821_v21  ;;  %2081 = vmatprep.subr.bf16.mxu0 %v2304_v31 }
 0x119   : > { %v590_v16 = vor.u32 %v589_v14, %v585_v13 }
 0x11b   : > { %v595_v19 = vsel %vm583_vm1, %v590_v16, %v594_v15  ;;  %2082 = vmatpush3.bf16.msra.mxu0 %v2250_v35  ;;  %v2275_v35 = vld [vmem:[%s2692_s4 + $0x10] sm:$0xff]  }
 0x11c   : > { %2035 = vmatprep.mubr.bf16.mxu1 %v595_v19  ;;  %2083 = vmatprep.subr.bf16.mxu0 %v2304_v31  ;;  %v2263_v19 = vld [vmem:[%s2691_s3 + $0x80] sm:$0xff]  }
 0x11d   : > { %2036 = vmatmul.mubr.bf16.vlgmr.msra.gmra.mrb[0].mxu1 %v598_v20 }
 0x11e   : > { %2060 = vmatpush3.bf16.msra.mxu1 %v2440_v25  ;;  %2075 = vmatprep.mubr.bf16.mxu1 %v822_v23  ;;  %v2243_v25 = vld [vmem:[%s2690_s2 + $0xa8] sm:$0xff]   ;;  %v2266_v23 = vld [vmem:[%s2691_s3 + $0x98] sm:$0xff]  }
 0x11f   : > { %2061 = vmatprep.subr.bf16.mxu1 %v2239_v22  ;;  %2084 = vmatpush3.bf16.msra.mxu0 %v2252_v37  ;;  %v2277_v37 = vld [vmem:[%s2692_s4 + $0x18] sm:$0xff]  }
 0x120   : > { %2085 = vmatprep.subr.bf16.mxu0 %v2304_v31 }
 0x122   : > { %2062 = vmatpush3.bf16.msra.mxu1 %v2239_v22  ;;  %v2265_v22 = vld [vmem:[%s2691_s3 + $0x90] sm:$0xff]  }
 0x123   : > { %2063 = vmatprep.subr.bf16.mxu1 %v2240_v24  ;;  %2086 = vmatpush3.bf16.msra.mxu0 %v2254_v39  ;;  %v2280_v39 = vld [vmem:[%s2692_s4 + $0x58] sm:$0xff]  }
 0x124   : > { %2087 = vmatprep.subr.bf16.mxu0 %v2304_v31 }
 0x126   : > { %2064 = vmatpush3.bf16.msra.mxu1 %v2240_v24  ;;  %v2267_v24 = vld [vmem:[%s2691_s3 + $0xa0] sm:$0xff]  }
 0x127   : > { %2065 = vmatprep.subr.bf16.mxu1 %v2241_v26  ;;  %2088 = vmatpush3.bf16.msra.mxu0 %v2256_v41  ;;  %v2282_v41 = vld [vmem:[%s2692_s4 + $0x60] sm:$0xff]  }
 0x128   : > { %2089 = vmatprep.subr.bf16.mxu0 %v2304_v31 }
 0x12a   : > { %2066 = vmatpush3.bf16.msra.mxu1 %v2241_v26  ;;  %v2268_v26 = vld [vmem:[%s2691_s3 + $0xa8] sm:$0xff]  }
 0x12b   : > { %2067 = vmatprep.subr.bf16.mxu1 %v2242_v27  ;;  %2090 = vmatpush3.bf16.msra.mxu0 %v2258_v43  ;;  %v2284_v43 = vld [vmem:[%s2692_s4 + $0x68] sm:$0xff]  }
 0x12c   : > { %2091 = vmatprep.subr.bf16.mxu0 %v2304_v31 }
 0x12e   : > { %2068 = vmatpush3.bf16.msra.mxu1 %v2242_v27  ;;  %v2269_v27 = vld [vmem:[%s2691_s3 + $0xb0] sm:$0xff]  }
 0x12f   : > { %2069 = vmatprep.subr.bf16.mxu1 %v2243_v25  ;;  %2092 = vmatpush3.bf16.msra.mxu0 %v2260_v45  ;;  %v2286_v45 = vld [vmem:[%s2692_s4 + $0x70] sm:$0xff]  }
 0x130   : > { %2093 = vmatprep.subr.bf16.mxu0 %v2304_v31 }
 0x132   : > { %2070 = vmatpush3.bf16.msra.mxu1 %v2243_v25  ;;  %v2270_v25 = vld [vmem:[%s2691_s3 + $0xb8] sm:$0xff]  }
 0x133   : > { %2071 = vmatprep.subr.bf16.mxu1 %v2244_v28  ;;  %2094 = vmatpush3.bf16.msra.mxu0 %v2261_v46  ;;  %v2287_v46 = vld [vmem:[%s2692_s4 + $0x78] sm:$0xff]  }
 0x134   : > { %2119 = vmatprep.subr.bf16.mxu0 %v2304_v31 }
 0x136   : > { %2072 = vmatpush3.bf16.msra.mxu1 %v2244_v28 }
 0x137   : > { %2073 = vmatprep.subr.bf16.mxu1 %v2245_v29 }
 0x13a   : > { %2074 = vmatpush3.bf16.msra.mxu1 %v2245_v29 }
 0x13b   : > { %2099 = vmatprep.subr.bf16.mxu1 %v2304_v31 }
 0x13d   : > { %2076 = vmatmul.mubr.bf16.vlgmr.msra.gmra.mrb[4].mxu1 %v821_v21  ;;  %v2264_v21 = vld [vmem:[%s2691_s3 + $0x88] sm:$0xff]  }
 0x13e   : > { %2100 = vmatpush3.bf16.msra.mxu1 %v2246_v30  ;;  %2115 = vmatprep.mubr.msk.bf16.mxu1 %vm2305_vm3, %v2304_v31  ;;  %v2272_v30 = vld [vmem:[%s2692_s4] sm:$0xff]  }
 0x13f   : > { %2101 = vmatprep.subr.bf16.mxu1 %v2304_v31 }
 0x142   : > { %2102 = vmatpush3.bf16.msra.mxu1 %v2247_v32  ;;  %v2274_v32 = vld [vmem:[%s2692_s4 + $0x40] sm:$0xff]  }
 0x143   : > { %2103 = vmatprep.subr.bf16.mxu1 %v2304_v31 }
 0x146   : > { %2104 = vmatpush3.bf16.msra.mxu1 %v2249_v34  ;;  %v2276_v34 = vld [vmem:[%s2692_s4 + $0x48] sm:$0xff]  }
 0x147   : > { %2105 = vmatprep.subr.bf16.mxu1 %v2304_v31 }
 0x14a   : > { %2106 = vmatpush3.bf16.msra.mxu1 %v2251_v36  ;;  %v2278_v36 = vld [vmem:[%s2692_s4 + $0x50] sm:$0xff]  }
 0x14b   : > { %2107 = vmatprep.subr.bf16.mxu1 %v2304_v31 }
 0x14e   : > { %2108 = vmatpush3.bf16.msra.mxu1 %v2253_v38  ;;  %v2279_v38 = vld [vmem:[%s2692_s4 + $0x20] sm:$0xff]  }
 0x14f   : > { %2109 = vmatprep.subr.bf16.mxu1 %v2304_v31 }
 0x152   : > { %2110 = vmatpush3.bf16.msra.mxu1 %v2255_v40  ;;  %v2281_v40 = vld [vmem:[%s2692_s4 + $0x28] sm:$0xff]  }
 0x153   : > { %2111 = vmatprep.subr.bf16.mxu1 %v2304_v31 }
 0x156   : > { %2112 = vmatpush3.bf16.msra.mxu1 %v2257_v42  ;;  %v2283_v42 = vld [vmem:[%s2692_s4 + $0x30] sm:$0xff]  }
 0x157   : > { %2113 = vmatprep.subr.bf16.mxu1 %v2304_v31 }
 0x15a   : > { %2114 = vmatpush3.bf16.msra.mxu1 %v2259_v44  ;;  %v2285_v44 = vld [vmem:[%s2692_s4 + $0x38] sm:$0xff]  }
 0x15b   : > { %2139 = vmatprep.subr.bf16.mxu1 %v2304_v31 }
 0x1e9   : > { %v2057_v47 = vpop.f32.mrb[8].mxu0 }
 0x1ea   : > { %v784_v48 = vpop.f32.mrb[9].mxu0 }
 0x1eb   : > { %v2058_v49 = vpop.f32.mrb[10].mxu0 }
 0x1ec   : > { %v787_v50 = vpop.f32.mrb[11].mxu0 }
 0x1f0   : > { %v2037_v51 = vpop.f32.mrb[0].mxu1 }
 0x1f1   : > { %v793_v52 = vadd.f32 %v2057_v47, %v2037_v51  ;;  %v683_v53 = vpop.f32.mrb[1].mxu1 }
 0x1f2   : > { %v785_v54 = vadd.f32 %v784_v48, %v683_v53  ;;  %v2038_v55 = vpop.f32.mrb[2].mxu1 }
 0x1f3   : > { %v686_v56 = vpop.f32.mrb[3].mxu1 }
 0x1f4   : > { %v788_v57 = vadd.f32 %v787_v50, %v686_v56 }
 0x210   : > { %v2077_v58 = vpop.f32.mrb[4].mxu1 }
 0x211   : > { %v923_v60 = vadd.f32 %v2077_v58, %v793_v52  ;;  %v907_v61 = vpop.f32.mrb[5].mxu1 }
 0x212   : > { %v921_v62 = vadd.f32 %v907_v61, %v785_v54  ;;  %v2078_v63 = vpop.f32.mrb[6].mxu1 }
 0x213   : > { %v933_v0 = vadd.f32 %v1778_v59, %v923_v60  ;;  %v910_v1 = vpop.f32.mrb[7].mxu1 }
 0x214   : > { %v931_v2 = vadd.f32 %v1778_v59, %v921_v62  ;;  %v922_v3 = vadd.f32 %v910_v1, %v788_v57  ;;  %v1837_v57 = vld [vmem:[%s2695_s7] ss:$0 sm:$0xff] }
 0x215   : > { %v936_v4 = vmax.f32 %v933_v0, 0.0 }
 0x216   : > { %v934_v5 = vmax.f32 %v931_v2, 0.0  ;;  %v932_v6 = vadd.f32 %v1778_v59, %v922_v3 }
 0x217   : > { %939 = vst [vmem:[#allocation2 + $0x10] sm:$0x3] %v936_v4 }
 0x218   : > { %937 = vst [vmem:[#allocation2] sm:$0xff] %v934_v5  ;;  %v935_v7 = vmax.f32 %v932_v6, 0.0  ;;  %v2288_v6 = vld [vmem:[%s2692_s4 + $0x80] sm:$0xff]  }
 0x21a   : > { %938 = vst [vmem:[#allocation2 + $0x8] sm:$0xff] %v935_v7 }
 0x221   : > { %v940_v8 = vld [vmem:[#allocation2] ss:$3 sm:$0x3f]  ;;  %v941_v9 = vld [vmem:[#allocation2 + $0x1] ss:$3 sm:$0x3f] }
 0x222   : > { %v943_v10 = vmax.f32 %v940_v8, %v941_v9  ;;  %v942_v11 = vld [vmem:[#allocation2 + $0x2] ss:$3 sm:$0x3f] }
 0x223   : > { %v2289_v8 = vld [vmem:[%s2692_s4 + $0x88] sm:$0xff]   ;;  %v2290_v9 = vld [vmem:[%s2692_s4 + $0x90] sm:$0xff]  }
 0x224   : > { %v944_v12 = vmax.f32 %v943_v10, %v942_v11  ;;  %v2291_v10 = vld [vmem:[%s2692_s4 + $0x98] sm:$0xff]   ;;  %v2292_v11 = vld [vmem:[%s2692_s4 + $0xa0] sm:$0xff]  }
 0x226   : > { %v945_v13 = vpack.c.bf16 %v944_v12, %v944_v12  ;;  %v2293_v12 = vld [vmem:[%s2692_s4 + $0xa8] sm:$0xff]  }
 0x228   : > { %946 = vst [vmem:[#allocation4] sm:$0x7] %v945_v13  ;;  %v2294_v13 = vld [vmem:[%s2692_s4 + $0xb0] sm:$0xff]  }
 0x22f   : > { %v947_v14 = vld [vmem:[#allocation4] sm:$0x3] }
 0x230   : > { %2116 = vmatmul.mubr.bf16.vlgmr.msra.gmra.mrb[8].mxu1 %v947_v14  ;;  %v2262_v15 = vld [vmem:[#allocation4] ss:$0 sps:$4 sm:$0x77]   ;;  %v2295_v14 = vld [vmem:[%s2692_s4 + $0xb8] sm:$0xff]  }
 0x231   : > { %2155 = vmatprep.mubr.msk.bf16.mxu1 %vm2305_vm3, %v2304_v31  ;;  %v988_v16 = vshll.u32 %v2262_v15, 16  ;;  %v986_v17 = vshrl.u32 %v2262_v15, 16  ;;  %v2271_v28 = vld [vmem:[#allocation4] ss:$0 sps:$4 sm:$0x66]   ;;  %2140 = vmatpush3.bf16.msra.mxu1 %v2274_v32 }
 0x232   : > { %v1190_v29 = vrot.slane %v2271_v28, 1  ;;  %2141 = vmatprep.subr.bf16.mxu1 %v2304_v31 }
 0x233   : > { %v990_v18 = vrot.slane %v988_v16, 1 }
 0x235   : > { %v991_v20 = vor.u32 %v990_v18, %v986_v17  ;;  %2142 = vmatpush3.bf16.msra.mxu1 %v2276_v34 }
 0x236   : > { %2143 = vmatprep.subr.bf16.mxu1 %v2304_v31 }
 0x237   : > { %2096 = vmatmul.mubr.bf16.vlgmr.msra.gmra.mrb[12].mxu0 %v991_v20 }
 0x238   : > { %2120 = vmatpush3.bf16.msra.mxu0 %v2263_v19  ;;  %2135 = vmatprep.mubr.msk.bf16.mxu0 %vm2305_vm3, %v2304_v31 }
 0x239   : > { %2121 = vmatprep.subr.bf16.mxu0 %v2304_v31  ;;  %2144 = vmatpush3.bf16.msra.mxu1 %v2278_v36 }
 0x23a   : > { %2145 = vmatprep.subr.bf16.mxu1 %v2304_v31 }
 0x23c   : > { %2122 = vmatpush3.bf16.msra.mxu0 %v2264_v21 }
 0x23d   : > { %2123 = vmatprep.subr.bf16.mxu0 %v2304_v31  ;;  %2146 = vmatpush3.bf16.msra.mxu1 %v2280_v39 }
 0x23e   : > { %2147 = vmatprep.subr.bf16.mxu1 %v2304_v31 }
 0x240   : > { %2124 = vmatpush3.bf16.msra.mxu0 %v2265_v22 }
 0x241   : > { %2125 = vmatprep.subr.bf16.mxu0 %v2304_v31  ;;  %2148 = vmatpush3.bf16.msra.mxu1 %v2282_v41 }
 0x242   : > { %2149 = vmatprep.subr.bf16.mxu1 %v2304_v31 }
 0x244   : > { %2126 = vmatpush3.bf16.msra.mxu0 %v2266_v23 }
 0x245   : > { %2127 = vmatprep.subr.bf16.mxu0 %v2304_v31  ;;  %2150 = vmatpush3.bf16.msra.mxu1 %v2284_v43 }
 0x246   : > { %2151 = vmatprep.subr.bf16.mxu1 %v2304_v31 }
 0x248   : > { %2128 = vmatpush3.bf16.msra.mxu0 %v2267_v24 }
 0x249   : > { %2129 = vmatprep.subr.bf16.mxu0 %v2304_v31  ;;  %2152 = vmatpush3.bf16.msra.mxu1 %v2286_v45 }
 0x24a   : > { %2153 = vmatprep.subr.bf16.mxu1 %v2304_v31 }
 0x24c   : > { %2130 = vmatpush3.bf16.msra.mxu0 %v2268_v26 }
 0x24d   : > { %2131 = vmatprep.subr.bf16.mxu0 %v2304_v31  ;;  %2154 = vmatpush3.bf16.msra.mxu1 %v2287_v46 }
 0x24e   : > { %2179 = vmatprep.subr.bf16.mxu1 %v2304_v31 }
 0x250   : > { %2132 = vmatpush3.bf16.msra.mxu0 %v2269_v27 }
 0x251   : > { %2133 = vmatprep.subr.bf16.mxu0 %v2304_v31 }
 0x254   : > { %2134 = vmatpush3.bf16.msra.mxu0 %v2270_v25  ;;  %v1896_v25 = vld [vmem:[%s2696_s8] ss:$0 sm:$0xff] }
 0x255   : > { %2159 = vmatprep.subr.bf16.mxu0 %v2304_v31 }
 0x257   : > { %2136 = vmatmul.mubr.bf16.vlgmr.msra.gmra.mrb[16].mxu0 %v1190_v29 }
 0x258   : > { %2175 = vmatprep.mubr.msk.bf16.mxu0 %vm2305_vm3, %v2304_v31  ;;  %2160 = vmatpush3.bf16.msra.mxu0 %v2272_v30 }
 0x259   : > { %2161 = vmatprep.subr.bf16.mxu0 %v2304_v31 }
 0x25c   : > { %2162 = vmatpush3.bf16.msra.mxu0 %v2273_v33 }
 0x25d   : > { %2163 = vmatprep.subr.bf16.mxu0 %v2304_v31 }
 0x260   : > { %2164 = vmatpush3.bf16.msra.mxu0 %v2275_v35 }
 0x261   : > { %2165 = vmatprep.subr.bf16.mxu0 %v2304_v31 }
 0x264   : > { %2166 = vmatpush3.bf16.msra.mxu0 %v2277_v37 }
 0x265   : > { %2167 = vmatprep.subr.bf16.mxu0 %v2304_v31 }
 0x268   : > { %2168 = vmatpush3.bf16.msra.mxu0 %v2279_v38 }
 0x269   : > { %2169 = vmatprep.subr.bf16.mxu0 %v2304_v31 }
 0x26c   : > { %2170 = vmatpush3.bf16.msra.mxu0 %v2281_v40 }
 0x26d   : > { %2171 = vmatprep.subr.bf16.mxu0 %v2304_v31 }
 0x270   : > { %2172 = vmatpush3.bf16.msra.mxu0 %v2283_v42 }
 0x271   : > { %2173 = vmatprep.subr.bf16.mxu0 %v2304_v31 }
 0x274   : > { %2174 = vmatpush3.bf16.msra.mxu0 %v2285_v44 }
 0x303   : > { %v1163_v47 = vpop.f32.mrb[8].mxu1 }
 0x304   : > { %v2117_v48 = vpop.f32.mrb[9].mxu1 }
 0x305   : > { %v1166_v49 = vpop.f32.mrb[10].mxu1 }
 0x306   : > { %v2118_v50 = vpop.f32.mrb[11].mxu1 }
 0x30a   : > { %v1075_v51 = vpop.f32.mrb[12].mxu0 }
 0x30b   : > { %v1164_v52 = vadd.f32 %v1163_v47, %v1075_v51  ;;  %v2097_v53 = vpop.f32.mrb[13].mxu0 }
 0x30c   : > { %v1078_v54 = vpop.f32.mrb[14].mxu0 }
 0x30d   : > { %v2098_v55 = vpop.f32.mrb[15].mxu0 }
 0x32a   : > { %v1274_v56 = vpop.f32.mrb[16].mxu0 }
 0x32b   : > { %v1280_v58 = vadd.f32 %v1274_v56, %v1164_v52  ;;  %v2137_v59 = vpop.f32.mrb[17].mxu0 }
 0x32c   : > { %v1277_v60 = vpop.f32.mrb[18].mxu0 }
 0x32d   : > { %v1288_v61 = vadd.f32 %v1837_v57, %v1280_v58  ;;  %v2138_v62 = vpop.f32.mrb[19].mxu0 }
 0x32f   : > { %v1289_v63 = vmax.f32 %v1288_v61, 0.0 }
 0x331   : > { %v1290_v0 = vpack.c.bf16 %v1289_v63, %v1289_v63 }
 0x333   : > { %1291 = vst [vmem:[#allocation5] sm:$0x3] %v1290_v0 }
 0x33a   : > { %v1292_v1 = vld [vmem:[#allocation5] sm:$0x1]  ;;  %v1887_v15 = vld.sshfl [vmem:[#allocation5] sm:$0x2 pattern:$0x76325410] }
 0x33b   : > { %v1854_v2 = vld.sshfl [vmem:[#allocation5] sm:$0x3 pattern:$0x76325410]  ;;  %2176 = vmatmul.mubr.bf16.vlgmr.msra.gmra.mrb[20].mxu0 %v1292_v1  ;;  %v1545_v16 = vrot.slane %v1887_v15, 1 }
 0x33c   : > { %v1338_v3 = vshll.u32 %v1854_v2, 16  ;;  %v1336_v4 = vshrl.u32 %v1854_v2, 16 }
 0x33e   : > { %v1340_v5 = vrot.slane %v1338_v3, 1 }
 0x340   : > { %v1341_v7 = vor.u32 %v1340_v5, %v1336_v4 }
 0x342   : > { %2156 = vmatmul.mubr.bf16.vlgmr.msra.gmra.mrb[12].mxu1 %v1341_v7 }
 0x343   : > { %2180 = vmatpush3.bf16.msra.mxu1 %v2288_v6  ;;  %2195 = vmatprep.mubr.msk.bf16.mxu1 %vm2305_vm3, %v2304_v31 }
 0x344   : > { %2181 = vmatprep.subr.bf16.mxu1 %v2304_v31 }
 0x347   : > { %2182 = vmatpush3.bf16.msra.mxu1 %v2289_v8 }
 0x348   : > { %2183 = vmatprep.subr.bf16.mxu1 %v2304_v31 }
 0x34b   : > { %2184 = vmatpush3.bf16.msra.mxu1 %v2290_v9 }
 0x34c   : > { %2185 = vmatprep.subr.bf16.mxu1 %v2304_v31 }
 0x34f   : > { %2186 = vmatpush3.bf16.msra.mxu1 %v2291_v10 }
 0x350   : > { %2187 = vmatprep.subr.bf16.mxu1 %v2304_v31 }
 0x353   : > { %2188 = vmatpush3.bf16.msra.mxu1 %v2292_v11 }
 0x354   : > { %2189 = vmatprep.subr.bf16.mxu1 %v2304_v31 }
 0x357   : > { %2190 = vmatpush3.bf16.msra.mxu1 %v2293_v12 }
 0x358   : > { %2191 = vmatprep.subr.bf16.mxu1 %v2304_v31 }
 0x35b   : > { %2192 = vmatpush3.bf16.msra.mxu1 %v2294_v13 }
 0x35c   : > { %2193 = vmatprep.subr.bf16.mxu1 %v2304_v31 }
 0x35f   : > { %2194 = vmatpush3.bf16.msra.mxu1 %v2295_v14 }
 0x362   : > { %2196 = vmatmul.mubr.bf16.vlgmr.msra.gmra.mrb[16].mxu1 %v1545_v16 }
 0x40e   : > { %v1513_v17 = vpop.f32.mrb[20].mxu0 }
 0x40f   : > { %v2177_v18 = vpop.f32.mrb[21].mxu0 }
 0x410   : > { %v1516_v19 = vpop.f32.mrb[22].mxu0 }
 0x411   : > { %v2178_v20 = vpop.f32.mrb[23].mxu0 }
 0x415   : > { %v1425_v21 = vpop.f32.mrb[12].mxu1 }
 0x416   : > { %v1514_v22 = vadd.f32 %v1513_v17, %v1425_v21  ;;  %v2157_v23 = vpop.f32.mrb[13].mxu1 }
 0x417   : > { %v1428_v24 = vpop.f32.mrb[14].mxu1 }
 0x418   : > { %v2158_v26 = vpop.f32.mrb[15].mxu1 }
 0x435   : > { %v1629_v27 = vpop.f32.mrb[16].mxu1 }
 0x436   : > { %v1635_v31 = vadd.f32 %v1629_v27, %v1514_v22  ;;  %v2197_v28 = vpop.f32.mrb[17].mxu1 }
 0x437   : > { %v1632_v29 = vpop.f32.mrb[18].mxu1 }
 0x438   : > { %v1643_v30 = vadd.f32 %v1896_v25, %v1635_v31  ;;  %v2198_v32 = vpop.f32.mrb[19].mxu1 }
 0x43a   : > { %v1644_v33 = vmax.f32 %v1643_v30, 0.0 }
 0x43c   : > { %v1645_v34 = vpack.c.bf16 %v1644_v33, %v1644_v33 }
 0x43e   : > { %1646 = vst [vmem:[%s328_s27] sm:$0x1] %v1645_v34 }
 0x43f PF: > { %s19_s30 = sadd.s32 1, %s2302_s30  }
 0x440   : > { %p16_p4 = scmp.ge.s32.totalorder %s19_s30, 18  }
 0x442   :  { %18 = sbr.rel (!%p16_p4) target bundleno = 1 (0x1), region = 100 }

// kernel: char_cnn_forward.7
= control target key start
LH: loop header
LB: loop body
LE: loop exit
PB: predicated region body
PF: predicated region fallthrough
CT: control target
= control target key end

     0   :  { %vm203_vm0 = vcmask 15360   ;;  %s391_s1 = inlined_call_operand.vmem [shape: bf16[256,2], index: 1, kind: input, shape index: {}]   ;;  %s392_s0 = inlined_call_operand.vmem [shape: bf16[16,256], index: 0, kind: input, shape index: {}]   ;;  %s393_s2 = inlined_call_operand.vmem [shape: f32[1,2], index: 2, kind: input, shape index: {}]   ;;  %s394_s3 = inlined_call_operand.vmem [shape: f32[16,2], index: 3, kind: output, shape index: {}]  }
   0x1   :  { %v275_v0 = vld [vmem:[%s391_s1 + $0x40] sm:$0xff]   ;;  %v277_v2 = vld [vmem:[%s391_s1 + $0x48] sm:$0xff]   ;;  %v279_v4 = vld [vmem:[%s391_s1 + $0x50] sm:$0xff]  }
   0x2   :  { %v276_v1 = vld [vmem:[%s391_s1] sm:$0xff]   ;;  %253 = vmatprep.subr.bf16.mxu0 %v275_v0  ;;  %v278_v3 = vld [vmem:[%s391_s1 + $0x8] sm:$0xff]   ;;  %v280_v5 = vld [vmem:[%s391_s1 + $0x10] sm:$0xff]  }
   0x3   :  { %254 = vmatpush3.bf16.msra.mxu0 %v276_v1  ;;  %v281_v6 = vld [vmem:[%s391_s1 + $0x58] sm:$0xff]   ;;  %v283_v8 = vld [vmem:[%s391_s1 + $0x60] sm:$0xff]   ;;  %v285_v10 = vld [vmem:[%s391_s1 + $0x68] sm:$0xff]  }
   0x4   :  { %255 = vmatprep.subr.bf16.mxu0 %v277_v2  ;;  %v282_v7 = vld [vmem:[%s391_s1 + $0x18] sm:$0xff]   ;;  %v284_v9 = vld [vmem:[%s391_s1 + $0x20] sm:$0xff]   ;;  %v286_v12 = vld [vmem:[%s391_s1 + $0x28] sm:$0xff]  }
   0x5   :  { %v293_v11 = vld [vmem:[%s392_s0 + $0x4] ss:$8 sps:$4 sm:$0xff]   ;;  %v287_v13 = vld [vmem:[%s391_s1 + $0x70] sm:$0xff]   ;;  %v289_v15 = vld [vmem:[%s391_s1 + $0x78] sm:$0xff]  }
   0x6   :  { %194 = vmatprep.mubr.bf16.mxu0 %v293_v11  ;;  %v288_v14 = vld [vmem:[%s391_s1 + $0x30] sm:$0xff]   ;;  %v290_v16 = vld [vmem:[%s391_s1 + $0x38] sm:$0xff]   ;;  %v291_v17 = vld [vmem:[%s392_s0] ss:$8 sps:$4 sm:$0xff]  }
   0x7   :  { %256 = vmatpush3.bf16.msra.mxu0 %v278_v3  ;;  %v234_v20 = vld [vmem:[%s393_s2] ss:$0 sm:$0xff] }
   0x8   :  { %257 = vmatprep.subr.bf16.mxu0 %v279_v4 }
   0xb   :  { %258 = vmatpush3.bf16.msra.mxu0 %v280_v5 }
   0xc   :  { %259 = vmatprep.subr.bf16.mxu0 %v281_v6 }
   0xf   :  { %260 = vmatpush3.bf16.msra.mxu0 %v282_v7 }
  0x10   :  { %261 = vmatprep.subr.bf16.mxu0 %v283_v8 }
  0x13   :  { %262 = vmatpush3.bf16.msra.mxu0 %v284_v9 }
  0x14   :  { %263 = vmatprep.subr.bf16.mxu0 %v285_v10 }
  0x17   :  { %264 = vmatpush3.bf16.msra.mxu0 %v286_v12 }
  0x18   :  { %265 = vmatprep.subr.bf16.mxu0 %v287_v13 }
  0x1b   :  { %266 = vmatpush3.bf16.msra.mxu0 %v288_v14 }
  0x1c   :  { %267 = vmatprep.subr.bf16.mxu0 %v289_v15 }
  0x1f   :  { %268 = vmatpush3.bf16.msra.mxu0 %v290_v16 }
  0x22   :  { %195 = vmatmul.mubr.bf16.vlgmr.msra.gmra.mrb[0].mxu0 %v291_v17 }
  0xf5   :  { %v269_v18 = vpop.f32.mrb[0].mxu0 }
  0xf6   :  { %v270_v19 = vpop.f32.mrb[1].mxu0 }
  0xf7   :  { %v271_v21 = vadd.f32 %v270_v19, %v269_v18  ;;  %v272_v22 = vpop.f32.mrb[2].mxu0 }
  0xf8   :  { %v273_v23 = vpop.f32.mrb[3].mxu0 }
  0xf9   :  { %v274_v24 = vadd.f32 %v273_v23, %v272_v22  ;;  %v197_v25 = vadd.f32 %v271_v21, %v234_v20 }
  0xfb   :  { %v204_v26 = vsel %vm203_vm0, %v197_v25, -inf  ;;  %v200_v27 = vadd.f32 %v274_v24, %v234_v20 }
  0xfc   :  { %205 = vmax.xlane.f32.xlu0 %v204_v26 }
  0xfd   :  { %v207_v28 = vsel %vm203_vm0, %v200_v27, -inf }
 0x100   :  { %208 = vmax.xlane.f32.xlu0 %v207_v28 }
 0x189   :  { %v206_v29 = vpop.xlane.xlu0 %205 }
 0x18a   :  { %v210_v30 = vsub.f32 %v197_v25, %v206_v29 }
 0x18c   :  { %v212_v31 = vmul.f32 1.442695, %v210_v30 }
 0x18d   :  { %v209_v32 = vpop.xlane.xlu0 %208 }
 0x18e   :  { %294 = vpow2.f32 %v212_v31  ;;  %v211_v33 = vsub.f32 %v200_v27, %v209_v32 }
 0x190   :  { %v214_v34 = vmul.f32 1.442695, %v211_v33 }
 0x192   :  { %296 = vpow2.f32 %v214_v34 }
 0x198   :  { %v295_v35 = vpop.eup %294 }
 0x199   :  { %v216_v36 = vsel %vm203_vm0, %v295_v35, 0.0 }
 0x19a   :  { %217 = vadd.xlane.f32.xlu1 %v216_v36 }
 0x19c   :  { %v297_v37 = vpop.eup %296 }
 0x19d   :  { %v219_v38 = vsel %vm203_vm0, %v297_v37, 0.0 }
 0x19e   :  { %220 = vadd.xlane.f32.xlu1 %v219_v38 }
 0x227   :  { %v218_v39 = vpop.xlane.xlu1 %217 }
 0x228   :  { %298 = vlog2.f32 %v218_v39 }
 0x22b   :  { %v221_v40 = vpop.xlane.xlu1 %220 }
 0x22c   :  { %300 = vlog2.f32 %v221_v40 }
 0x232   :  { %v299_v41 = vpop.eup %298 }
 0x233   :  { %v223_v42 = vmul.f32 0.6931472, %v299_v41 }
 0x235   :  { %v226_v43 = vsub.f32 %v210_v30, %v223_v42 }
 0x236   :  { %v301_v44 = vpop.eup %300 }
 0x237   :  { %228 = vst.msk [vmem:[%s394_s3] sm:$0xff] %vm203_vm0, %v226_v43  ;;  %v225_v45 = vmul.f32 0.6931472, %v301_v44 }
 0x239   :  { %v227_v46 = vsub.f32 %v211_v33, %v225_v45 }
 0x23b   :  { %229 = vst.msk [vmem:[%s394_s3 + $0x8] sm:$0xff] %vm203_vm0, %v227_v46 }

</bundles_post_ra>
